<compile_context>
chip_gen: v5e
topology: v5e:2x2
jax: 0.10.0
libtpu: 0.0.40
codegen_flags: <defaults>
</compile_context>

<pallas_src>
import jax
import jax.numpy as jnp
from jax import lax
from jax.experimental import pallas as pl
from jax.experimental.pallas import tpu as pltpu


def _gru_seq_kernel(x_ref, wih_r_ref, wih_z_ref, wih_n_ref,
                    whh_r_ref, whh_z_ref, whh_n_ref,
                    b_r_ref, b_z_ref, b_in_ref, b_hn_ref, h0_ref,
                    hseq_ref, hout_ref,
                    gi_r_scr, gi_z_scr, gi_n_scr):
    seq = hseq_ref.shape[0]

    # ---- hoisted input transform: one M=seq matmul per gate ----
    x = x_ref[...]                                                   # (seq, H), already ReLU'd
    gi_r_scr[...] = jnp.dot(x, wih_r_ref[...], preferred_element_type=jnp.float32) + b_r_ref[...]
    gi_z_scr[...] = jnp.dot(x, wih_z_ref[...], preferred_element_type=jnp.float32) + b_z_ref[...]
    gi_n_scr[...] = jnp.dot(x, wih_n_ref[...], preferred_element_type=jnp.float32) + b_in_ref[...]

    whh_r = whh_r_ref[...]
    whh_z = whh_z_ref[...]
    whh_n = whh_n_ref[...]
    b_hn = b_hn_ref[...]

    # ---- serial recurrence: only h-dependent work remains on the critical path ----
    def step(t, h):
        g_r = gi_r_scr[pl.ds(t, 1), :] + jnp.dot(h, whh_r, preferred_element_type=jnp.float32)
        g_z = gi_z_scr[pl.ds(t, 1), :] + jnp.dot(h, whh_z, preferred_element_type=jnp.float32)
        r = jax.nn.sigmoid(g_r)
        z = jax.nn.sigmoid(g_z)
        h_n = jnp.dot(h, whh_n, preferred_element_type=jnp.float32) + b_hn
        n = jnp.tanh(gi_n_scr[pl.ds(t, 1), :] + r * h_n)
        h_new = (1.0 - z) * n + z * h
        hseq_ref[pl.ds(t, 1), :] = h_new
        return h_new

    unroll = True if seq <= 32 else 8
    h_last = lax.fori_loop(0, seq, step, h0_ref[...], unroll=unroll)
    hout_ref[...] = h_last


def _proj_logsoftmax_kernel(h_ref, wout_ref, bout_ref, logp_ref):
    # batched (tile_seq, H) @ (H, vocab) + stable row-wise log-softmax, lane-dense store
    logits = jnp.dot(h_ref[...], wout_ref[...],
                     preferred_element_type=jnp.float32) + bout_ref[...]
    m = jnp.max(logits, axis=-1, keepdims=True)
    lse = jnp.log(jnp.sum(jnp.exp(logits - m), axis=-1, keepdims=True)) + m
    logp_ref[...] = logits - lse


def prepare_kernel_params(params):
    """One-time layout conversion (transpose / per-gate split / bias folding)."""
    wih, whh = params["wih"], params["whh"]
    bih, bhh = params["bih"], params["bhh"]
    H = wih.shape[1]

    def gate(w, i):                      # torch rows are [r | z | n]; store transposed (H, H)
        return jnp.asarray(w[i * H:(i + 1) * H, :].T)

    return dict(
        emb=params["emb"],                                   # (V, H): gathered in XLA, not in VMEM
        wih_r=gate(wih, 0), wih_z=gate(wih, 1), wih_n=gate(wih, 2),
        whh_r=gate(whh, 0), whh_z=gate(whh, 1), whh_n=gate(whh, 2),
        b_r=(bih[0:H] + bhh[0:H]).reshape(1, H),             # fold b_ir + b_hr
        b_z=(bih[H:2 * H] + bhh[H:2 * H]).reshape(1, H),     # fold b_iz + b_hz
        b_in=bih[2 * H:3 * H].reshape(1, H),                 # keep separate (GRU n-gate semantics)
        b_hn=bhh[2 * H:3 * H].reshape(1, H),
        wout_t=jnp.asarray(params["wout"].T),                # (H, V), pre-transposed once
        bout=params["bout"].reshape(1, -1),                  # (1, V)
    )


def decoder_rnn_forward(input_ids, hidden, kparams):
    """input_ids: (1, seq) int32 (batch_first, batch=1); hidden: (1, 1, H) f32."""
    emb = kparams["emb"]
    V, H = emb.shape
    seq = input_ids.shape[1]

    tok = input_ids[0].astype(jnp.int32)                     # (seq,)
    # Embedding gather + ReLU in XLA: the table stays in HBM; OOB ids clamp safely.
    x_seq = jnp.maximum(emb[tok], 0.0).astype(jnp.float32)   # (seq, H)
    h0 = hidden.reshape(1, H).astype(jnp.float32)

    # VMEM limit sized to the actual resident buffers (clamped to fit every generation).
    resident_bytes = 4 * (6 * seq * H + 6 * H * H + 4 * H + 2 * H
                          + seq * V + H * V + V)
    vmem_limit = int(min(48 * 2**20, max(32 * 2**20, 2 * resident_bytes)))

    # ---- kernel 1: GRU recurrence (single program; recurrence is inherently serial) ----
    hseq, h_out = pl.pallas_call(
        _gru_seq_kernel,
        out_shape=(jax.ShapeDtypeStruct((seq, H), jnp.float32),
                   jax.ShapeDtypeStruct((1, H), jnp.float32)),
        in_specs=[pl.BlockSpec(memory_space=pltpu.MemorySpace.VMEM)] * 12,
        out_specs=(pl.BlockSpec(memory_space=pltpu.MemorySpace.VMEM),
                   pl.BlockSpec(memory_space=pltpu.MemorySpace.VMEM)),
        scratch_shapes=[pltpu.VMEM((seq, H), jnp.float32)] * 3,
        compiler_params=pltpu.CompilerParams(vmem_limit_bytes=vmem_limit),
    )(x_seq,
      kparams["wih_r"], kparams["wih_z"], kparams["wih_n"],
      kparams["whh_r"], kparams["whh_z"], kparams["whh_n"],
      kparams["b_r"], kparams["b_z"], kparams["b_in"], kparams["b_hn"],
      h0)

    # ---- kernel 2: projection + log-softmax, seq-tiled "parallel" grid ----
    # TODO(synk): for very large vocab on v7x (64 MiB VMEM), additionally tile wout_t/logp
    # over vocab with a two-pass (online) log-softmax.
    ts = min(seq, 128)
    grid = (pl.cdiv(seq, ts),)
    logp = pl.pallas_call(
        _proj_logsoftmax_kernel,
        out_shape=jax.ShapeDtypeStruct((seq, V), jnp.float32),
        grid=grid,
        in_specs=[pl.BlockSpec((ts, H), lambda i: (i, 0)),
                  pl.BlockSpec((H, V), lambda i: (0, 0)),
                  pl.BlockSpec((1, V), lambda i: (0, 0))],
        out_specs=pl.BlockSpec((ts, V), lambda i: (i, 0)),
        compiler_params=pltpu.CompilerParams(
            dimension_semantics=("parallel",),
            vmem_limit_bytes=vmem_limit),
    )(hseq, kparams["wout_t"], kparams["bout"])

    return logp, h_out.reshape(1, 1, H)


def init_params(key, output_size, hidden_size):
    H, V = hidden_size, output_size
    ks = jax.random.split(key, 7)
    bound = 1.0 / float(jnp.sqrt(jnp.float32(H)))
    return dict(
        emb=jax.random.normal(ks[0], (V, H), jnp.float32),
        wih=jax.random.uniform(ks[1], (3 * H, H), jnp.float32, -bound, bound),
        whh=jax.random.uniform(ks[2], (3 * H, H), jnp.float32, -bound, bound),
        bih=jax.random.uniform(ks[3], (3 * H,), jnp.float32, -bound, bound),
        bhh=jax.random.uniform(ks[4], (3 * H,), jnp.float32, -bound, bound),
        wout=jax.random.uniform(ks[5], (V, H), jnp.float32, -bound, bound),
        bout=jax.random.uniform(ks[6], (V,), jnp.float32, -bound, bound),
    )


def reference_forward(input_ids, hidden, params):
    """Pure-JAX mirror of the PyTorch DecoderRNN.forward for verification."""
    emb, wih, whh = params["emb"], params["wih"], params["whh"]
    bih, bhh, wout, bout = params["bih"], params["bhh"], params["wout"], params["bout"]
    H = hidden.shape[-1]
    tok = input_ids[0]
    h = hidden.reshape(1, H)
    outs = []
    for t in range(tok.shape[0]):
        x = jnp.maximum(emb[tok[t]][None, :], 0.0)
        gi = x @ wih.T + bih
        gh = h @ whh.T + bhh
        r = jax.nn.sigmoid(gi[:, 0:H] + gh[:, 0:H])
        z = jax.nn.sigmoid(gi[:, H:2 * H] + gh[:, H:2 * H])
        n = jnp.tanh(gi[:, 2 * H:3 * H] + r * gh[:, 2 * H:3 * H])
        h = (1.0 - z) * n + z * h
        logits = h @ wout.T + bout
        outs.append(jax.nn.log_softmax(logits, axis=-1)[0])
    return jnp.stack(outs, axis=0), h.reshape(1, 1, H)


if __name__ == "__main__":
    output_size, hidden_size, seq_len = 16, 32, 8   # small vocab, hidden=32, batch=1

    key = jax.random.PRNGKey(0)
    kp, kt, kh = jax.random.split(key, 3)
    params = init_params(kp, output_size, hidden_size)
    kparams = prepare_kernel_params(params)
    input_ids = jax.random.randint(kt, (1, seq_len), 0, output_size, dtype=jnp.int32)
    hidden = jax.random.normal(kh, (1, 1, hidden_size), jnp.float32)

    logp, h_out = decoder_rnn_forward(input_ids, hidden, kparams)
    jax.block_until_ready((logp, h_out))

    ref_logp, ref_h = reference_forward(input_ids, hidden, params)
    assert logp.shape == (seq_len, output_size) and h_out.shape == (1, 1, hidden_size)
    assert jnp.allclose(logp, ref_logp, atol=2e-5, rtol=2e-5), "log-softmax output mismatch"
    assert jnp.allclose(h_out, ref_h, atol=2e-5, rtol=2e-5), "hidden state mismatch"

    print("KERNEL_OK")
</pallas_src>

<mosaic_0001>
module attributes {stable_mosaic.version = 11 : i64} {
  func.func @_gru_seq_kernel(%arg0: memref<8x32xf32, #tpu.memory_space<vmem>>, %arg1: memref<32x32xf32, #tpu.memory_space<vmem>>, %arg2: memref<32x32xf32, #tpu.memory_space<vmem>>, %arg3: memref<32x32xf32, #tpu.memory_space<vmem>>, %arg4: memref<32x32xf32, #tpu.memory_space<vmem>>, %arg5: memref<32x32xf32, #tpu.memory_space<vmem>>, %arg6: memref<32x32xf32, #tpu.memory_space<vmem>>, %arg7: memref<1x32xf32, #tpu.memory_space<vmem>>, %arg8: memref<1x32xf32, #tpu.memory_space<vmem>>, %arg9: memref<1x32xf32, #tpu.memory_space<vmem>>, %arg10: memref<1x32xf32, #tpu.memory_space<vmem>>, %arg11: memref<1x32xf32, #tpu.memory_space<vmem>>, %arg12: memref<8x32xf32, #tpu.memory_space<vmem>>, %arg13: memref<1x32xf32, #tpu.memory_space<vmem>>, %arg14: memref<8x32xf32, #tpu.memory_space<vmem>>, %arg15: memref<8x32xf32, #tpu.memory_space<vmem>>, %arg16: memref<8x32xf32, #tpu.memory_space<vmem>>) attributes {dimension_semantics = [], scalar_prefetch = 0 : i64, scratch_operands = 3 : i64, tpu.core_type = #tpu.core_type<tc>} {
    %c0 = arith.constant 0 : index
    %c0_0 = arith.constant 0 : index
    %0 = vector.load %arg0[%c0, %c0_0] : memref<8x32xf32, #tpu.memory_space<vmem>>, vector<8x32xf32>
    %c0_1 = arith.constant 0 : index
    %c0_2 = arith.constant 0 : index
    %1 = vector.load %arg1[%c0_1, %c0_2] : memref<32x32xf32, #tpu.memory_space<vmem>>, vector<32x32xf32>
    %cst = arith.constant dense<0.000000e+00> : vector<8x32xf32>
    %2 = tpu.matmul %0, %1, %cst {dimension_numbers = #tpu.dot_dimension_numbers<[1], [0], [0], [1], [0, 0, 1, 1], [], []>} : vector<8x32xf32>, vector<32x32xf32>, vector<8x32xf32> -> vector<8x32xf32>
    %c0_3 = arith.constant 0 : index
    %c0_4 = arith.constant 0 : index
    %3 = vector.load %arg7[%c0_3, %c0_4] : memref<1x32xf32, #tpu.memory_space<vmem>>, vector<1x32xf32>
    %4 = vector.broadcast %3 : vector<1x32xf32> to vector<8x32xf32>
    %5 = arith.addf %2, %4 : vector<8x32xf32>
    %c0_5 = arith.constant 0 : index
    %c0_6 = arith.constant 0 : index
    %6 = vector.load %arg14[%c0_5, %c0_6] : memref<8x32xf32, #tpu.memory_space<vmem>>, vector<8x32xf32>
    tpu.vector_store %arg14[%c0_5, %c0_6], %5 {strides = array<i32>} : memref<8x32xf32, #tpu.memory_space<vmem>>, vector<8x32xf32>,
    %c0_7 = arith.constant 0 : index
    %c0_8 = arith.constant 0 : index
    %7 = vector.load %arg2[%c0_7, %c0_8] : memref<32x32xf32, #tpu.memory_space<vmem>>, vector<32x32xf32>
    %cst_9 = arith.constant dense<0.000000e+00> : vector<8x32xf32>
    %8 = tpu.matmul %0, %7, %cst_9 {dimension_numbers = #tpu.dot_dimension_numbers<[1], [0], [0], [1], [0, 0, 1, 1], [], []>} : vector<8x32xf32>, vector<32x32xf32>, vector<8x32xf32> -> vector<8x32xf32>
    %c0_10 = arith.constant 0 : index
    %c0_11 = arith.constant 0 : index
    %9 = vector.load %arg8[%c0_10, %c0_11] : memref<1x32xf32, #tpu.memory_space<vmem>>, vector<1x32xf32>
    %10 = vector.broadcast %9 : vector<1x32xf32> to vector<8x32xf32>
    %11 = arith.addf %8, %10 : vector<8x32xf32>
    %c0_12 = arith.constant 0 : index
    %c0_13 = arith.constant 0 : index
    %12 = vector.load %arg15[%c0_12, %c0_13] : memref<8x32xf32, #tpu.memory_space<vmem>>, vector<8x32xf32>
    tpu.vector_store %arg15[%c0_12, %c0_13], %11 {strides = array<i32>} : memref<8x32xf32, #tpu.memory_space<vmem>>, vector<8x32xf32>,
    %c0_14 = arith.constant 0 : index
    %c0_15 = arith.constant 0 : index
    %13 = vector.load %arg3[%c0_14, %c0_15] : memref<32x32xf32, #tpu.memory_space<vmem>>, vector<32x32xf32>
    %cst_16 = arith.constant dense<0.000000e+00> : vector<8x32xf32>
    %14 = tpu.matmul %0, %13, %cst_16 {dimension_numbers = #tpu.dot_dimension_numbers<[1], [0], [0], [1], [0, 0, 1, 1], [], []>} : vector<8x32xf32>, vector<32x32xf32>, vector<8x32xf32> -> vector<8x32xf32>
    %c0_17 = arith.constant 0 : index
    %c0_18 = arith.constant 0 : index
    %15 = vector.load %arg9[%c0_17, %c0_18] : memref<1x32xf32, #tpu.memory_space<vmem>>, vector<1x32xf32>
    %16 = vector.broadcast %15 : vector<1x32xf32> to vector<8x32xf32>
    %17 = arith.addf %14, %16 : vector<8x32xf32>
    %c0_19 = arith.constant 0 : index
    %c0_20 = arith.constant 0 : index
    %18 = vector.load %arg16[%c0_19, %c0_20] : memref<8x32xf32, #tpu.memory_space<vmem>>, vector<8x32xf32>
    tpu.vector_store %arg16[%c0_19, %c0_20], %17 {strides = array<i32>} : memref<8x32xf32, #tpu.memory_space<vmem>>, vector<8x32xf32>,
    %c0_21 = arith.constant 0 : index
    %c0_22 = arith.constant 0 : index
    %19 = vector.load %arg4[%c0_21, %c0_22] : memref<32x32xf32, #tpu.memory_space<vmem>>, vector<32x32xf32>
    %c0_23 = arith.constant 0 : index
    %c0_24 = arith.constant 0 : index
    %20 = vector.load %arg5[%c0_23, %c0_24] : memref<32x32xf32, #tpu.memory_space<vmem>>, vector<32x32xf32>
    %c0_25 = arith.constant 0 : index
    %c0_26 = arith.constant 0 : index
    %21 = vector.load %arg6[%c0_25, %c0_26] : memref<32x32xf32, #tpu.memory_space<vmem>>, vector<32x32xf32>
    %c0_27 = arith.constant 0 : index
    %c0_28 = arith.constant 0 : index
    %22 = vector.load %arg10[%c0_27, %c0_28] : memref<1x32xf32, #tpu.memory_space<vmem>>, vector<1x32xf32>
    %c0_29 = arith.constant 0 : index
    %c0_30 = arith.constant 0 : index
    %23 = vector.load %arg11[%c0_29, %c0_30] : memref<1x32xf32, #tpu.memory_space<vmem>>, vector<1x32xf32>
    %c0_i32 = arith.constant 0 : i32
    %24 = arith.index_cast %c0_i32 : i32 to index
    %c0_31 = arith.constant 0 : index
    %25 = vector.load %arg14[%24, %c0_31] : memref<8x32xf32, #tpu.memory_space<vmem>>, vector<1x32xf32>
    %cst_32 = arith.constant dense<0.000000e+00> : vector<1x32xf32>
    %26 = tpu.matmul %23, %19, %cst_32 {dimension_numbers = #tpu.dot_dimension_numbers<[1], [0], [0], [1], [0, 0, 1, 1], [], []>} : vector<1x32xf32>, vector<32x32xf32>, vector<1x32xf32> -> vector<1x32xf32>
    %27 = arith.addf %25, %26 : vector<1x32xf32>
    %28 = arith.index_cast %c0_i32 : i32 to index
    %c0_33 = arith.constant 0 : index
    %29 = vector.load %arg15[%28, %c0_33] : memref<8x32xf32, #tpu.memory_space<vmem>>, vector<1x32xf32>
    %cst_34 = arith.constant dense<0.000000e+00> : vector<1x32xf32>
    %30 = tpu.matmul %23, %20, %cst_34 {dimension_numbers = #tpu.dot_dimension_numbers<[1], [0], [0], [1], [0, 0, 1, 1], [], []>} : vector<1x32xf32>, vector<32x32xf32>, vector<1x32xf32> -> vector<1x32xf32>
    %31 = arith.addf %29, %30 : vector<1x32xf32>
    %32 = arith.negf %27 : vector<1x32xf32>
    %33 = math.exp %32 : vector<1x32xf32>
    %cst_35 = arith.constant 1.000000e+00 : f32
    %34 = vector.broadcast %cst_35 : f32 to vector<1x32xf32>
    %35 = arith.addf %34, %33 : vector<1x32xf32>
    %36 = arith.divf %34, %35 : vector<1x32xf32>
    %37 = arith.negf %31 : vector<1x32xf32>
    %38 = math.exp %37 : vector<1x32xf32>
    %cst_36 = arith.constant 1.000000e+00 : f32
    %39 = vector.broadcast %cst_36 : f32 to vector<1x32xf32>
    %40 = arith.addf %39, %38 : vector<1x32xf32>
    %41 = arith.divf %39, %40 : vector<1x32xf32>
    %cst_37 = arith.constant dense<0.000000e+00> : vector<1x32xf32>
    %42 = tpu.matmul %23, %21, %cst_37 {dimension_numbers = #tpu.dot_dimension_numbers<[1], [0], [0], [1], [0, 0, 1, 1], [], []>} : vector<1x32xf32>, vector<32x32xf32>, vector<1x32xf32> -> vector<1x32xf32>
    %43 = arith.addf %42, %22 : vector<1x32xf32>
    %44 = arith.index_cast %c0_i32 : i32 to index
    %c0_38 = arith.constant 0 : index
    %45 = vector.load %arg16[%44, %c0_38] : memref<8x32xf32, #tpu.memory_space<vmem>>, vector<1x32xf32>
    %46 = arith.mulf %36, %43 : vector<1x32xf32>
    %47 = arith.addf %45, %46 : vector<1x32xf32>
    %48 = math.tanh %47 : vector<1x32xf32>
    %cst_39 = arith.constant 1.000000e+00 : f32
    %49 = vector.broadcast %cst_39 : f32 to vector<1x32xf32>
    %50 = arith.subf %49, %41 : vector<1x32xf32>
    %51 = arith.mulf %50, %48 : vector<1x32xf32>
    %52 = arith.mulf %41, %23 : vector<1x32xf32>
    %53 = arith.addf %51, %52 : vector<1x32xf32>
    %54 = arith.index_cast %c0_i32 : i32 to index
    %c0_40 = arith.constant 0 : index
    %55 = vector.load %arg12[%54, %c0_40] : memref<8x32xf32, #tpu.memory_space<vmem>>, vector<1x32xf32>
    tpu.vector_store %arg12[%54, %c0_40], %53 {strides = array<i32>} : memref<8x32xf32, #tpu.memory_space<vmem>>, vector<1x32xf32>,
    %c1_i32 = arith.constant 1 : i32
    %56 = arith.index_cast %c1_i32 : i32 to index
    %c0_41 = arith.constant 0 : index
    %57 = vector.load %arg14[%56, %c0_41] : memref<8x32xf32, #tpu.memory_space<vmem>>, vector<1x32xf32>
    %cst_42 = arith.constant dense<0.000000e+00> : vector<1x32xf32>
    %58 = tpu.matmul %53, %19, %cst_42 {dimension_numbers = #tpu.dot_dimension_numbers<[1], [0], [0], [1], [0, 0, 1, 1], [], []>} : vector<1x32xf32>, vector<32x32xf32>, vector<1x32xf32> -> vector<1x32xf32>
    %59 = arith.addf %57, %58 : vector<1x32xf32>
    %60 = arith.index_cast %c1_i32 : i32 to index
    %c0_43 = arith.constant 0 : index
    %61 = vector.load %arg15[%60, %c0_43] : memref<8x32xf32, #tpu.memory_space<vmem>>, vector<1x32xf32>
    %cst_44 = arith.constant dense<0.000000e+00> : vector<1x32xf32>
    %62 = tpu.matmul %53, %20, %cst_44 {dimension_numbers = #tpu.dot_dimension_numbers<[1], [0], [0], [1], [0, 0, 1, 1], [], []>} : vector<1x32xf32>, vector<32x32xf32>, vector<1x32xf32> -> vector<1x32xf32>
    %63 = arith.addf %61, %62 : vector<1x32xf32>
    %64 = arith.negf %59 : vector<1x32xf32>
    %65 = math.exp %64 : vector<1x32xf32>
    %cst_45 = arith.constant 1.000000e+00 : f32
    %66 = vector.broadcast %cst_45 : f32 to vector<1x32xf32>
    %67 = arith.addf %66, %65 : vector<1x32xf32>
    %68 = arith.divf %66, %67 : vector<1x32xf32>
    %69 = arith.negf %63 : vector<1x32xf32>
    %70 = math.exp %69 : vector<1x32xf32>
    %cst_46 = arith.constant 1.000000e+00 : f32
    %71 = vector.broadcast %cst_46 : f32 to vector<1x32xf32>
    %72 = arith.addf %71, %70 : vector<1x32xf32>
    %73 = arith.divf %71, %72 : vector<1x32xf32>
    %cst_47 = arith.constant dense<0.000000e+00> : vector<1x32xf32>
    %74 = tpu.matmul %53, %21, %cst_47 {dimension_numbers = #tpu.dot_dimension_numbers<[1], [0], [0], [1], [0, 0, 1, 1], [], []>} : vector<1x32xf32>, vector<32x32xf32>, vector<1x32xf32> -> vector<1x32xf32>
    %75 = arith.addf %74, %22 : vector<1x32xf32>
    %76 = arith.index_cast %c1_i32 : i32 to index
    %c0_48 = arith.constant 0 : index
    %77 = vector.load %arg16[%76, %c0_48] : memref<8x32xf32, #tpu.memory_space<vmem>>, vector<1x32xf32>
    %78 = arith.mulf %68, %75 : vector<1x32xf32>
    %79 = arith.addf %77, %78 : vector<1x32xf32>
    %80 = math.tanh %79 : vector<1x32xf32>
    %cst_49 = arith.constant 1.000000e+00 : f32
    %81 = vector.broadcast %cst_49 : f32 to vector<1x32xf32>
    %82 = arith.subf %81, %73 : vector<1x32xf32>
    %83 = arith.mulf %82, %80 : vector<1x32xf32>
    %84 = arith.mulf %73, %53 : vector<1x32xf32>
    %85 = arith.addf %83, %84 : vector<1x32xf32>
    %86 = arith.index_cast %c1_i32 : i32 to index
    %c0_50 = arith.constant 0 : index
    %87 = vector.load %arg12[%86, %c0_50] : memref<8x32xf32, #tpu.memory_space<vmem>>, vector<1x32xf32>
    tpu.vector_store %arg12[%86, %c0_50], %85 {strides = array<i32>} : memref<8x32xf32, #tpu.memory_space<vmem>>, vector<1x32xf32>,
    %c2_i32 = arith.constant 2 : i32
    %88 = arith.index_cast %c2_i32 : i32 to index
    %c0_51 = arith.constant 0 : index
    %89 = vector.load %arg14[%88, %c0_51] : memref<8x32xf32, #tpu.memory_space<vmem>>, vector<1x32xf32>
    %cst_52 = arith.constant dense<0.000000e+00> : vector<1x32xf32>
    %90 = tpu.matmul %85, %19, %cst_52 {dimension_numbers = #tpu.dot_dimension_numbers<[1], [0], [0], [1], [0, 0, 1, 1], [], []>} : vector<1x32xf32>, vector<32x32xf32>, vector<1x32xf32> -> vector<1x32xf32>
    %91 = arith.addf %89, %90 : vector<1x32xf32>
    %92 = arith.index_cast %c2_i32 : i32 to index
    %c0_53 = arith.constant 0 : index
    %93 = vector.load %arg15[%92, %c0_53] : memref<8x32xf32, #tpu.memory_space<vmem>>, vector<1x32xf32>
    %cst_54 = arith.constant dense<0.000000e+00> : vector<1x32xf32>
    %94 = tpu.matmul %85, %20, %cst_54 {dimension_numbers = #tpu.dot_dimension_numbers<[1], [0], [0], [1], [0, 0, 1, 1], [], []>} : vector<1x32xf32>, vector<32x32xf32>, vector<1x32xf32> -> vector<1x32xf32>
    %95 = arith.addf %93, %94 : vector<1x32xf32>
    %96 = arith.negf %91 : vector<1x32xf32>
    %97 = math.exp %96 : vector<1x32xf32>
    %cst_55 = arith.constant 1.000000e+00 : f32
    %98 = vector.broadcast %cst_55 : f32 to vector<1x32xf32>
    %99 = arith.addf %98, %97 : vector<1x32xf32>
    %100 = arith.divf %98, %99 : vector<1x32xf32>
    %101 = arith.negf %95 : vector<1x32xf32>
    %102 = math.exp %101 : vector<1x32xf32>
    %cst_56 = arith.constant 1.000000e+00 : f32
    %103 = vector.broadcast %cst_56 : f32 to vector<1x32xf32>
    %104 = arith.addf %103, %102 : vector<1x32xf32>
    %105 = arith.divf %103, %104 : vector<1x32xf32>
    %cst_57 = arith.constant dense<0.000000e+00> : vector<1x32xf32>
    %106 = tpu.matmul %85, %21, %cst_57 {dimension_numbers = #tpu.dot_dimension_numbers<[1], [0], [0], [1], [0, 0, 1, 1], [], []>} : vector<1x32xf32>, vector<32x32xf32>, vector<1x32xf32> -> vector<1x32xf32>
    %107 = arith.addf %106, %22 : vector<1x32xf32>
    %108 = arith.index_cast %c2_i32 : i32 to index
    %c0_58 = arith.constant 0 : index
    %109 = vector.load %arg16[%108, %c0_58] : memref<8x32xf32, #tpu.memory_space<vmem>>, vector<1x32xf32>
    %110 = arith.mulf %100, %107 : vector<1x32xf32>
    %111 = arith.addf %109, %110 : vector<1x32xf32>
    %112 = math.tanh %111 : vector<1x32xf32>
    %cst_59 = arith.constant 1.000000e+00 : f32
    %113 = vector.broadcast %cst_59 : f32 to vector<1x32xf32>
    %114 = arith.subf %113, %105 : vector<1x32xf32>
    %115 = arith.mulf %114, %112 : vector<1x32xf32>
    %116 = arith.mulf %105, %85 : vector<1x32xf32>
    %117 = arith.addf %115, %116 : vector<1x32xf32>
    %118 = arith.index_cast %c2_i32 : i32 to index
    %c0_60 = arith.constant 0 : index
    %119 = vector.load %arg12[%118, %c0_60] : memref<8x32xf32, #tpu.memory_space<vmem>>, vector<1x32xf32>
    tpu.vector_store %arg12[%118, %c0_60], %117 {strides = array<i32>} : memref<8x32xf32, #tpu.memory_space<vmem>>, vector<1x32xf32>,
    %c3_i32 = arith.constant 3 : i32
    %120 = arith.index_cast %c3_i32 : i32 to index
    %c0_61 = arith.constant 0 : index
    %121 = vector.load %arg14[%120, %c0_61] : memref<8x32xf32, #tpu.memory_space<vmem>>, vector<1x32xf32>
    %cst_62 = arith.constant dense<0.000000e+00> : vector<1x32xf32>
    %122 = tpu.matmul %117, %19, %cst_62 {dimension_numbers = #tpu.dot_dimension_numbers<[1], [0], [0], [1], [0, 0, 1, 1], [], []>} : vector<1x32xf32>, vector<32x32xf32>, vector<1x32xf32> -> vector<1x32xf32>
    %123 = arith.addf %121, %122 : vector<1x32xf32>
    %124 = arith.index_cast %c3_i32 : i32 to index
    %c0_63 = arith.constant 0 : index
    %125 = vector.load %arg15[%124, %c0_63] : memref<8x32xf32, #tpu.memory_space<vmem>>, vector<1x32xf32>
    %cst_64 = arith.constant dense<0.000000e+00> : vector<1x32xf32>
    %126 = tpu.matmul %117, %20, %cst_64 {dimension_numbers = #tpu.dot_dimension_numbers<[1], [0], [0], [1], [0, 0, 1, 1], [], []>} : vector<1x32xf32>, vector<32x32xf32>, vector<1x32xf32> -> vector<1x32xf32>
    %127 = arith.addf %125, %126 : vector<1x32xf32>
    %128 = arith.negf %123 : vector<1x32xf32>
    %129 = math.exp %128 : vector<1x32xf32>
    %cst_65 = arith.constant 1.000000e+00 : f32
    %130 = vector.broadcast %cst_65 : f32 to vector<1x32xf32>
    %131 = arith.addf %130, %129 : vector<1x32xf32>
    %132 = arith.divf %130, %131 : vector<1x32xf32>
    %133 = arith.negf %127 : vector<1x32xf32>
    %134 = math.exp %133 : vector<1x32xf32>
    %cst_66 = arith.constant 1.000000e+00 : f32
    %135 = vector.broadcast %cst_66 : f32 to vector<1x32xf32>
    %136 = arith.addf %135, %134 : vector<1x32xf32>
    %137 = arith.divf %135, %136 : vector<1x32xf32>
    %cst_67 = arith.constant dense<0.000000e+00> : vector<1x32xf32>
    %138 = tpu.matmul %117, %21, %cst_67 {dimension_numbers = #tpu.dot_dimension_numbers<[1], [0], [0], [1], [0, 0, 1, 1], [], []>} : vector<1x32xf32>, vector<32x32xf32>, vector<1x32xf32> -> vector<1x32xf32>
    %139 = arith.addf %138, %22 : vector<1x32xf32>
    %140 = arith.index_cast %c3_i32 : i32 to index
    %c0_68 = arith.constant 0 : index
    %141 = vector.load %arg16[%140, %c0_68] : memref<8x32xf32, #tpu.memory_space<vmem>>, vector<1x32xf32>
    %142 = arith.mulf %132, %139 : vector<1x32xf32>
    %143 = arith.addf %141, %142 : vector<1x32xf32>
    %144 = math.tanh %143 : vector<1x32xf32>
    %cst_69 = arith.constant 1.000000e+00 : f32
    %145 = vector.broadcast %cst_69 : f32 to vector<1x32xf32>
    %146 = arith.subf %145, %137 : vector<1x32xf32>
    %147 = arith.mulf %146, %144 : vector<1x32xf32>
    %148 = arith.mulf %137, %117 : vector<1x32xf32>
    %149 = arith.addf %147, %148 : vector<1x32xf32>
    %150 = arith.index_cast %c3_i32 : i32 to index
    %c0_70 = arith.constant 0 : index
    %151 = vector.load %arg12[%150, %c0_70] : memref<8x32xf32, #tpu.memory_space<vmem>>, vector<1x32xf32>
    tpu.vector_store %arg12[%150, %c0_70], %149 {strides = array<i32>} : memref<8x32xf32, #tpu.memory_space<vmem>>, vector<1x32xf32>,
    %c4_i32 = arith.constant 4 : i32
    %152 = arith.index_cast %c4_i32 : i32 to index
    %c0_71 = arith.constant 0 : index
    %153 = vector.load %arg14[%152, %c0_71] : memref<8x32xf32, #tpu.memory_space<vmem>>, vector<1x32xf32>
    %cst_72 = arith.constant dense<0.000000e+00> : vector<1x32xf32>
    %154 = tpu.matmul %149, %19, %cst_72 {dimension_numbers = #tpu.dot_dimension_numbers<[1], [0], [0], [1], [0, 0, 1, 1], [], []>} : vector<1x32xf32>, vector<32x32xf32>, vector<1x32xf32> -> vector<1x32xf32>
    %155 = arith.addf %153, %154 : vector<1x32xf32>
    %156 = arith.index_cast %c4_i32 : i32 to index
    %c0_73 = arith.constant 0 : index
    %157 = vector.load %arg15[%156, %c0_73] : memref<8x32xf32, #tpu.memory_space<vmem>>, vector<1x32xf32>
    %cst_74 = arith.constant dense<0.000000e+00> : vector<1x32xf32>
    %158 = tpu.matmul %149, %20, %cst_74 {dimension_numbers = #tpu.dot_dimension_numbers<[1], [0], [0], [1], [0, 0, 1, 1], [], []>} : vector<1x32xf32>, vector<32x32xf32>, vector<1x32xf32> -> vector<1x32xf32>
    %159 = arith.addf %157, %158 : vector<1x32xf32>
    %160 = arith.negf %155 : vector<1x32xf32>
    %161 = math.exp %160 : vector<1x32xf32>
    %cst_75 = arith.constant 1.000000e+00 : f32
    %162 = vector.broadcast %cst_75 : f32 to vector<1x32xf32>
    %163 = arith.addf %162, %161 : vector<1x32xf32>
    %164 = arith.divf %162, %163 : vector<1x32xf32>
    %165 = arith.negf %159 : vector<1x32xf32>
    %166 = math.exp %165 : vector<1x32xf32>
    %cst_76 = arith.constant 1.000000e+00 : f32
    %167 = vector.broadcast %cst_76 : f32 to vector<1x32xf32>
    %168 = arith.addf %167, %166 : vector<1x32xf32>
    %169 = arith.divf %167, %168 : vector<1x32xf32>
    %cst_77 = arith.constant dense<0.000000e+00> : vector<1x32xf32>
    %170 = tpu.matmul %149, %21, %cst_77 {dimension_numbers = #tpu.dot_dimension_numbers<[1], [0], [0], [1], [0, 0, 1, 1], [], []>} : vector<1x32xf32>, vector<32x32xf32>, vector<1x32xf32> -> vector<1x32xf32>
    %171 = arith.addf %170, %22 : vector<1x32xf32>
    %172 = arith.index_cast %c4_i32 : i32 to index
    %c0_78 = arith.constant 0 : index
    %173 = vector.load %arg16[%172, %c0_78] : memref<8x32xf32, #tpu.memory_space<vmem>>, vector<1x32xf32>
    %174 = arith.mulf %164, %171 : vector<1x32xf32>
    %175 = arith.addf %173, %174 : vector<1x32xf32>
    %176 = math.tanh %175 : vector<1x32xf32>
    %cst_79 = arith.constant 1.000000e+00 : f32
    %177 = vector.broadcast %cst_79 : f32 to vector<1x32xf32>
    %178 = arith.subf %177, %169 : vector<1x32xf32>
    %179 = arith.mulf %178, %176 : vector<1x32xf32>
    %180 = arith.mulf %169, %149 : vector<1x32xf32>
    %181 = arith.addf %179, %180 : vector<1x32xf32>
    %182 = arith.index_cast %c4_i32 : i32 to index
    %c0_80 = arith.constant 0 : index
    %183 = vector.load %arg12[%182, %c0_80] : memref<8x32xf32, #tpu.memory_space<vmem>>, vector<1x32xf32>
    tpu.vector_store %arg12[%182, %c0_80], %181 {strides = array<i32>} : memref<8x32xf32, #tpu.memory_space<vmem>>, vector<1x32xf32>,
    %c5_i32 = arith.constant 5 : i32
    %184 = arith.index_cast %c5_i32 : i32 to index
    %c0_81 = arith.constant 0 : index
    %185 = vector.load %arg14[%184, %c0_81] : memref<8x32xf32, #tpu.memory_space<vmem>>, vector<1x32xf32>
    %cst_82 = arith.constant dense<0.000000e+00> : vector<1x32xf32>
    %186 = tpu.matmul %181, %19, %cst_82 {dimension_numbers = #tpu.dot_dimension_numbers<[1], [0], [0], [1], [0, 0, 1, 1], [], []>} : vector<1x32xf32>, vector<32x32xf32>, vector<1x32xf32> -> vector<1x32xf32>
    %187 = arith.addf %185, %186 : vector<1x32xf32>
    %188 = arith.index_cast %c5_i32 : i32 to index
    %c0_83 = arith.constant 0 : index
    %189 = vector.load %arg15[%188, %c0_83] : memref<8x32xf32, #tpu.memory_space<vmem>>, vector<1x32xf32>
    %cst_84 = arith.constant dense<0.000000e+00> : vector<1x32xf32>
    %190 = tpu.matmul %181, %20, %cst_84 {dimension_numbers = #tpu.dot_dimension_numbers<[1], [0], [0], [1], [0, 0, 1, 1], [], []>} : vector<1x32xf32>, vector<32x32xf32>, vector<1x32xf32> -> vector<1x32xf32>
    %191 = arith.addf %189, %190 : vector<1x32xf32>
    %192 = arith.negf %187 : vector<1x32xf32>
    %193 = math.exp %192 : vector<1x32xf32>
    %cst_85 = arith.constant 1.000000e+00 : f32
    %194 = vector.broadcast %cst_85 : f32 to vector<1x32xf32>
    %195 = arith.addf %194, %193 : vector<1x32xf32>
    %196 = arith.divf %194, %195 : vector<1x32xf32>
    %197 = arith.negf %191 : vector<1x32xf32>
    %198 = math.exp %197 : vector<1x32xf32>
    %cst_86 = arith.constant 1.000000e+00 : f32
    %199 = vector.broadcast %cst_86 : f32 to vector<1x32xf32>
    %200 = arith.addf %199, %198 : vector<1x32xf32>
    %201 = arith.divf %199, %200 : vector<1x32xf32>
    %cst_87 = arith.constant dense<0.000000e+00> : vector<1x32xf32>
    %202 = tpu.matmul %181, %21, %cst_87 {dimension_numbers = #tpu.dot_dimension_numbers<[1], [0], [0], [1], [0, 0, 1, 1], [], []>} : vector<1x32xf32>, vector<32x32xf32>, vector<1x32xf32> -> vector<1x32xf32>
    %203 = arith.addf %202, %22 : vector<1x32xf32>
    %204 = arith.index_cast %c5_i32 : i32 to index
    %c0_88 = arith.constant 0 : index
    %205 = vector.load %arg16[%204, %c0_88] : memref<8x32xf32, #tpu.memory_space<vmem>>, vector<1x32xf32>
    %206 = arith.mulf %196, %203 : vector<1x32xf32>
    %207 = arith.addf %205, %206 : vector<1x32xf32>
    %208 = math.tanh %207 : vector<1x32xf32>
    %cst_89 = arith.constant 1.000000e+00 : f32
    %209 = vector.broadcast %cst_89 : f32 to vector<1x32xf32>
    %210 = arith.subf %209, %201 : vector<1x32xf32>
    %211 = arith.mulf %210, %208 : vector<1x32xf32>
    %212 = arith.mulf %201, %181 : vector<1x32xf32>
    %213 = arith.addf %211, %212 : vector<1x32xf32>
    %214 = arith.index_cast %c5_i32 : i32 to index
    %c0_90 = arith.constant 0 : index
    %215 = vector.load %arg12[%214, %c0_90] : memref<8x32xf32, #tpu.memory_space<vmem>>, vector<1x32xf32>
    tpu.vector_store %arg12[%214, %c0_90], %213 {strides = array<i32>} : memref<8x32xf32, #tpu.memory_space<vmem>>, vector<1x32xf32>,
    %c6_i32 = arith.constant 6 : i32
    %216 = arith.index_cast %c6_i32 : i32 to index
    %c0_91 = arith.constant 0 : index
    %217 = vector.load %arg14[%216, %c0_91] : memref<8x32xf32, #tpu.memory_space<vmem>>, vector<1x32xf32>
    %cst_92 = arith.constant dense<0.000000e+00> : vector<1x32xf32>
    %218 = tpu.matmul %213, %19, %cst_92 {dimension_numbers = #tpu.dot_dimension_numbers<[1], [0], [0], [1], [0, 0, 1, 1], [], []>} : vector<1x32xf32>, vector<32x32xf32>, vector<1x32xf32> -> vector<1x32xf32>
    %219 = arith.addf %217, %218 : vector<1x32xf32>
    %220 = arith.index_cast %c6_i32 : i32 to index
    %c0_93 = arith.constant 0 : index
    %221 = vector.load %arg15[%220, %c0_93] : memref<8x32xf32, #tpu.memory_space<vmem>>, vector<1x32xf32>
    %cst_94 = arith.constant dense<0.000000e+00> : vector<1x32xf32>
    %222 = tpu.matmul %213, %20, %cst_94 {dimension_numbers = #tpu.dot_dimension_numbers<[1], [0], [0], [1], [0, 0, 1, 1], [], []>} : vector<1x32xf32>, vector<32x32xf32>, vector<1x32xf32> -> vector<1x32xf32>
    %223 = arith.addf %221, %222 : vector<1x32xf32>
    %224 = arith.negf %219 : vector<1x32xf32>
    %225 = math.exp %224 : vector<1x32xf32>
    %cst_95 = arith.constant 1.000000e+00 : f32
    %226 = vector.broadcast %cst_95 : f32 to vector<1x32xf32>
    %227 = arith.addf %226, %225 : vector<1x32xf32>
    %228 = arith.divf %226, %227 : vector<1x32xf32>
    %229 = arith.negf %223 : vector<1x32xf32>
    %230 = math.exp %229 : vector<1x32xf32>
    %cst_96 = arith.constant 1.000000e+00 : f32
    %231 = vector.broadcast %cst_96 : f32 to vector<1x32xf32>
    %232 = arith.addf %231, %230 : vector<1x32xf32>
    %233 = arith.divf %231, %232 : vector<1x32xf32>
    %cst_97 = arith.constant dense<0.000000e+00> : vector<1x32xf32>
    %234 = tpu.matmul %213, %21, %cst_97 {dimension_numbers = #tpu.dot_dimension_numbers<[1], [0], [0], [1], [0, 0, 1, 1], [], []>} : vector<1x32xf32>, vector<32x32xf32>, vector<1x32xf32> -> vector<1x32xf32>
    %235 = arith.addf %234, %22 : vector<1x32xf32>
    %236 = arith.index_cast %c6_i32 : i32 to index
    %c0_98 = arith.constant 0 : index
    %237 = vector.load %arg16[%236, %c0_98] : memref<8x32xf32, #tpu.memory_space<vmem>>, vector<1x32xf32>
    %238 = arith.mulf %228, %235 : vector<1x32xf32>
    %239 = arith.addf %237, %238 : vector<1x32xf32>
    %240 = math.tanh %239 : vector<1x32xf32>
    %cst_99 = arith.constant 1.000000e+00 : f32
    %241 = vector.broadcast %cst_99 : f32 to vector<1x32xf32>
    %242 = arith.subf %241, %233 : vector<1x32xf32>
    %243 = arith.mulf %242, %240 : vector<1x32xf32>
    %244 = arith.mulf %233, %213 : vector<1x32xf32>
    %245 = arith.addf %243, %244 : vector<1x32xf32>
    %246 = arith.index_cast %c6_i32 : i32 to index
    %c0_100 = arith.constant 0 : index
    %247 = vector.load %arg12[%246, %c0_100] : memref<8x32xf32, #tpu.memory_space<vmem>>, vector<1x32xf32>
    tpu.vector_store %arg12[%246, %c0_100], %245 {strides = array<i32>} : memref<8x32xf32, #tpu.memory_space<vmem>>, vector<1x32xf32>,
    %c7_i32 = arith.constant 7 : i32
    %248 = arith.index_cast %c7_i32 : i32 to index
    %c0_101 = arith.constant 0 : index
    %249 = vector.load %arg14[%248, %c0_101] : memref<8x32xf32, #tpu.memory_space<vmem>>, vector<1x32xf32>
    %cst_102 = arith.constant dense<0.000000e+00> : vector<1x32xf32>
    %250 = tpu.matmul %245, %19, %cst_102 {dimension_numbers = #tpu.dot_dimension_numbers<[1], [0], [0], [1], [0, 0, 1, 1], [], []>} : vector<1x32xf32>, vector<32x32xf32>, vector<1x32xf32> -> vector<1x32xf32>
    %251 = arith.addf %249, %250 : vector<1x32xf32>
    %252 = arith.index_cast %c7_i32 : i32 to index
    %c0_103 = arith.constant 0 : index
    %253 = vector.load %arg15[%252, %c0_103] : memref<8x32xf32, #tpu.memory_space<vmem>>, vector<1x32xf32>
    %cst_104 = arith.constant dense<0.000000e+00> : vector<1x32xf32>
    %254 = tpu.matmul %245, %20, %cst_104 {dimension_numbers = #tpu.dot_dimension_numbers<[1], [0], [0], [1], [0, 0, 1, 1], [], []>} : vector<1x32xf32>, vector<32x32xf32>, vector<1x32xf32> -> vector<1x32xf32>
    %255 = arith.addf %253, %254 : vector<1x32xf32>
    %256 = arith.negf %251 : vector<1x32xf32>
    %257 = math.exp %256 : vector<1x32xf32>
    %cst_105 = arith.constant 1.000000e+00 : f32
    %258 = vector.broadcast %cst_105 : f32 to vector<1x32xf32>
    %259 = arith.addf %258, %257 : vector<1x32xf32>
    %260 = arith.divf %258, %259 : vector<1x32xf32>
    %261 = arith.negf %255 : vector<1x32xf32>
    %262 = math.exp %261 : vector<1x32xf32>
    %cst_106 = arith.constant 1.000000e+00 : f32
    %263 = vector.broadcast %cst_106 : f32 to vector<1x32xf32>
    %264 = arith.addf %263, %262 : vector<1x32xf32>
    %265 = arith.divf %263, %264 : vector<1x32xf32>
    %cst_107 = arith.constant dense<0.000000e+00> : vector<1x32xf32>
    %266 = tpu.matmul %245, %21, %cst_107 {dimension_numbers = #tpu.dot_dimension_numbers<[1], [0], [0], [1], [0, 0, 1, 1], [], []>} : vector<1x32xf32>, vector<32x32xf32>, vector<1x32xf32> -> vector<1x32xf32>
    %267 = arith.addf %266, %22 : vector<1x32xf32>
    %268 = arith.index_cast %c7_i32 : i32 to index
    %c0_108 = arith.constant 0 : index
    %269 = vector.load %arg16[%268, %c0_108] : memref<8x32xf32, #tpu.memory_space<vmem>>, vector<1x32xf32>
    %270 = arith.mulf %260, %267 : vector<1x32xf32>
    %271 = arith.addf %269, %270 : vector<1x32xf32>
    %272 = math.tanh %271 : vector<1x32xf32>
    %cst_109 = arith.constant 1.000000e+00 : f32
    %273 = vector.broadcast %cst_109 : f32 to vector<1x32xf32>
    %274 = arith.subf %273, %265 : vector<1x32xf32>
    %275 = arith.mulf %274, %272 : vector<1x32xf32>
    %276 = arith.mulf %265, %245 : vector<1x32xf32>
    %277 = arith.addf %275, %276 : vector<1x32xf32>
    %278 = arith.index_cast %c7_i32 : i32 to index
    %c0_110 = arith.constant 0 : index
    %279 = vector.load %arg12[%278, %c0_110] : memref<8x32xf32, #tpu.memory_space<vmem>>, vector<1x32xf32>
    tpu.vector_store %arg12[%278, %c0_110], %277 {strides = array<i32>} : memref<8x32xf32, #tpu.memory_space<vmem>>, vector<1x32xf32>,
    %c8_i32 = arith.constant 8 : i32
    %c0_111 = arith.constant 0 : index
    %c0_112 = arith.constant 0 : index
    %280 = vector.load %arg13[%c0_111, %c0_112] : memref<1x32xf32, #tpu.memory_space<vmem>>, vector<1x32xf32>
    tpu.vector_store %arg13[%c0_111, %c0_112], %277 {strides = array<i32>} : memref<1x32xf32, #tpu.memory_space<vmem>>, vector<1x32xf32>,
    return
  }
}

</mosaic_0001>

<bundles_post_ra>
// kernel: tpu_custom_call.1
= control target key start
LH: loop header
LB: loop body
LE: loop exit
PB: predicated region body
PF: predicated region fallthrough
CT: control target
= control target key end

     0   :  { %19 = vsyncpa [#allocation6], 0  ;;  %s1917_s0 = inlined_call_operand.hbm [shape: f32[8,32], index: 0, kind: input, shape index: {}]   ;;  %s1918_s1 = inlined_call_operand.hbm [shape: f32[32,32], index: 1, kind: input, shape index: {}]   ;;  %s1919_s2 = inlined_call_operand.hbm [shape: f32[32,32], index: 2, kind: input, shape index: {}]   ;;  %s1920_s3 = inlined_call_operand.hbm [shape: f32[32,32], index: 3, kind: input, shape index: {}]   ;;  %s1921_s4 = inlined_call_operand.hbm [shape: f32[32,32], index: 4, kind: input, shape index: {}]   ;;  %s1922_s5 = inlined_call_operand.hbm [shape: f32[32,32], index: 5, kind: input, shape index: {}]   ;;  %s1923_s6 = inlined_call_operand.hbm [shape: f32[32,32], index: 6, kind: input, shape index: {}]   ;;  %s1924_s7 = inlined_call_operand.vmem [shape: f32[1,32], index: 7, kind: input, shape index: {}]   ;;  %s1925_s8 = inlined_call_operand.vmem [shape: f32[1,32], index: 8, kind: input, shape index: {}]   ;;  %s1926_s9 = inlined_call_operand.vmem [shape: f32[1,32], index: 9, kind: input, shape index: {}]   ;;  %s1927_s10 = inlined_call_operand.vmem [shape: f32[1,32], index: 10, kind: input, shape index: {}]   ;;  %s1928_s11 = inlined_call_operand.vmem [shape: f32[1,32], index: 11, kind: input, shape index: {}]   ;;  %s1929_s12 = inlined_call_operand.hbm [shape: f32[8,32], index: 12, kind: output, shape index: {0}]   ;;  %s1930_s13 = inlined_call_operand.hbm [shape: f32[1,32], index: 13, kind: output, shape index: {1}]  }
   0x1   :  { %20 = vsyncpa [#allocation9], 0 }
   0x2   :  { %21 = vsyncpa [#allocation12], 0 }
   0x3   :  { %22 = vsyncpa [#allocation15], 0 }
   0x4   :  { %23 = vsyncpa [#allocation7], 0  ;;  %s40_s27 = sshll.u32 %s1918_s1, 4  ;;  %s41_s27 = int_to_ptr.hbm [resolvable:$true] %s40_s27 }
   0x5   :  { %24 = vsyncpa [#allocation19], 0  ;;  %s1573_s28 = smov [#allocation8]   ;;  %s66_s15 = sshll.u32 %s1920_s3, 4  ;;  %s67_s15 = int_to_ptr.hbm [resolvable:$true] %s66_s15 }
   0x6   :  { %s42_s29 = sshll.u32 %s1573_s28, 4  ;;  %s1574_s16 = smov 128   ;;  %s43_s29 = int_to_ptr.vmem [resolvable:$true] %s42_s29 }
   0x7   :  { %s1575_s17 = smov 8   ;;  %s1576_s18 = smov [#allocation11]  }
   0x8   :  { %48 = dma.hbm_to_vmem [thread:$0]  %s41_s27, 512, %s43_s29, [#allocation9], %s1574_s16, %s1574_s16, %s1575_s17  }
   0x9   :  { %s68_s19 = sshll.u32 %s1576_s18, 4  ;;  %s92_s21 = sshll.u32 %s1922_s5, 4  ;;  %s69_s19 = int_to_ptr.vmem [resolvable:$true] %s68_s19  ;;  %s93_s21 = int_to_ptr.hbm [resolvable:$true] %s92_s21 }
   0xa   :  { %74 = dma.hbm_to_vmem [thread:$0]  %s67_s15, 512, %s69_s19, [#allocation12], %s1574_s16, %s1574_s16, %s1575_s17  }
   0xb   :  { %s30_s23 = sshll.u32 %s1917_s0, 4  ;;  %s1577_s24 = smov [#allocation14]   ;;  %s31_s23 = int_to_ptr.hbm [resolvable:$true] %s30_s23 }
   0xc   :  { %s94_s25 = sshll.u32 %s1577_s24, 4  ;;  %s1578_s26 = smov [#allocation5]   ;;  %s95_s25 = int_to_ptr.vmem [resolvable:$true] %s94_s25 }
   0xd   :  { %100 = dma.hbm_to_vmem [thread:$0]  %s93_s21, 512, %s95_s25, [#allocation15], %s1574_s16, %s1574_s16, %s1575_s17  }
   0xe   :  { %s32_s5 = sshll.u32 %s1578_s26, 4  ;;  %s53_s29 = sshll.u32 %s1919_s2, 4  ;;  %s33_s5 = int_to_ptr.vmem [resolvable:$true] %s32_s5  ;;  %s54_s29 = int_to_ptr.hbm [resolvable:$true] %s53_s29 }
   0xf   :  { %35 = dma.hbm_to_vmem [thread:$0]  %s31_s23, 128, %s33_s5, [#allocation6]  }
  0x10   :  { %s79_s0 = sshll.u32 %s1921_s4, 4  ;;  %s1579_s15 = smov [#allocation10]   ;;  %s80_s0 = int_to_ptr.hbm [resolvable:$true] %s79_s0 }
  0x11   :  { %s55_s18 = sshll.u32 %s1579_s15, 4  ;;  %s1580_s19 = smov [#allocation13]   ;;  %s56_s18 = int_to_ptr.vmem [resolvable:$true] %s55_s18 }
  0x12   :  { %61 = dma.hbm_to_vmem [thread:$0]  %s54_s29, 512, %s56_s18, [#allocation9], %s1574_s16, %s1574_s16, %s1575_s17  }
  0x13   :  { %s81_s20 = sshll.u32 %s1580_s19, 4  ;;  %s105_s2 = sshll.u32 %s1923_s6, 4  ;;  %s82_s20 = int_to_ptr.vmem [resolvable:$true] %s81_s20  ;;  %s106_s2 = int_to_ptr.hbm [resolvable:$true] %s105_s2 }
  0x14   :  { %87 = dma.hbm_to_vmem [thread:$0]  %s80_s0, 512, %s82_s20, [#allocation12], %s1574_s16, %s1574_s16, %s1575_s17  }
  0x15   :  { %s1581_s4 = smov [#allocation16]  }
  0x16   :  { %s107_s3 = sshll.u32 %s1581_s4, 4  ;;  %s108_s3 = int_to_ptr.vmem [resolvable:$true] %s107_s3 }
  0x17   :  { %113 = dma.hbm_to_vmem [thread:$0]  %s106_s2, 512, %s108_s3, [#allocation15], %s1574_s16, %s1574_s16, %s1575_s17  }
  0x18   :  { %1561 = dma.done.wait [#allocation6], 128  }
  0x19   :  { %1562 = vsyncadd [#allocation6], 4294967168 }
  0x1a   :  { %1563 = dma.done.wait [#allocation9], 1024  }
  0x1b   :  { %1564 = vsyncadd [#allocation9], 4294966272 }
  0x1c   :  { %1565 = dma.done.wait [#allocation12], 1024  }
  0x1d   :  { %1566 = vsyncadd [#allocation12], 4294966272 }
  0x1e   :  { %1567 = dma.done.wait [#allocation15], 1024  }
  0x1f   :  { %1568 = vsyncadd [#allocation15], 4294966272  ;;  %v156_v0 = vld [vmem:[#allocation8 + $0x18] sm:$0xff]  ;;  %v155_v2 = vld [vmem:[#allocation8 + $0x10] sm:$0xff]  ;;  %vm161_vm0 = vcmask 261120   ;;  %vm371_vm9 = vcmask 253952  }
  0x20   :  { %v189_v1 = vld [vmem:[#allocation10 + $0x18] sm:$0xff]  ;;  %177 = vmatpush.msra.mxu0 %v156_v0  ;;  %v188_v3 = vld [vmem:[#allocation10 + $0x10] sm:$0xff]  ;;  %v154_v4 = vld [vmem:[#allocation8 + $0x8] sm:$0xff]  ;;  %s1179_s27 = sshll.u32 %s1929_s12, 4  ;;  %s1583_s28 = smov [#allocation18]   ;;  %s1180_s27 = int_to_ptr.hbm [resolvable:$true] %s1179_s27 }
  0x21   :  { %206 = vmatpush.msra.mxu1 %v189_v1  ;;  %v187_v5 = vld [vmem:[#allocation10 + $0x8] sm:$0xff]  ;;  %v1693_v6 = vld [vmem:[#allocation13 + $0x18] sm:$0xff]  ;;  %v1695_v7 = vld [vmem:[#allocation13 + $0x10] sm:$0xff]  ;;  %s1188_s29 = sshll.u32 %s1583_s28, 4  ;;  %s1190_s0 = sshll.u32 %s1930_s13, 4  ;;  %s1189_s29 = int_to_ptr.vmem [resolvable:$true] %s1188_s29  ;;  %s1191_s0 = int_to_ptr.hbm [resolvable:$true] %s1190_s0 }
  0x22   :  { %178 = vmatpush.msra.mxu0 %v155_v2  ;;  %274 = vmatpush.msra.mxu3 %v1693_v6  ;;  %v153_v8 = vld [vmem:[#allocation8] sm:$0xff]  ;;  %v152_v10 = vld [vmem:[#allocation5] sm:$0xff]  ;;  %v1699_v11 = vld [vmem:[#allocation13 + $0x8] sm:$0xff] }
  0x23   :  { %207 = vmatpush.msra.mxu1 %v188_v3  ;;  %v186_v9 = vld [vmem:[#allocation10] sm:$0xff]  ;;  %v1701_v12 = vld [vmem:[#allocation14 + $0x18] sm:$0xff]  ;;  %v1714_v17 = vld [vmem:[#allocation14 + $0x10] sm:$0xff] }
  0x24   :  { %179 = vmatpush.msra.mxu0 %v154_v4  ;;  %275 = vmatpush.msra.mxu3 %v1695_v7  ;;  %v1703_v13 = vld [vmem:[#allocation13] sm:$0xff]  ;;  %v218_v14 = vld [vmem:[#allocation11 + $0x18] sm:$0xff]  ;;  %v217_v18 = vld [vmem:[#allocation11 + $0x10] sm:$0xff] }
  0x25   :  { %208 = vmatpush.msra.mxu1 %v187_v5  ;;  %v1705_v15 = vld [vmem:[#allocation16 + $0x18] sm:$0xff]  ;;  %v1712_v16 = vld [vmem:[%s1928_s11] sm:$0x1]  ;;  %v1718_v19 = vld [vmem:[#allocation14 + $0x8] sm:$0xff]  ;;  %235 = vmatpush.msra.mxu2 %v218_v14 }
  0x26   :  { %180 = vmatpush.msra.mxu0 %v153_v8  ;;  %276 = vmatpush.msra.mxu3 %v1699_v11  ;;  %v1721_v20 = vld [vmem:[#allocation16 + $0x10] sm:$0xff]  ;;  %v216_v21 = vld [vmem:[#allocation11 + $0x8] sm:$0xff]  ;;  %v1727_v22 = vld [vmem:[#allocation14] sm:$0xff] }
  0x27   :  { %209 = vmatpush.msra.mxu1 %v186_v9  ;;  %1208 = vmatmul.msk.f32.vlgmr.msra.gmra.mxu0 %vm161_vm0, %v152_v10  ;;  %v1729_v23 = vld [vmem:[#allocation16 + $0x8] sm:$0xff]  ;;  %v215_v24 = vld [vmem:[#allocation11] sm:$0xff] }
  0x28   :  { %1209 = vmatmul.msk.f32.vlgmr.msra.gmra.mxu1 %vm161_vm0, %v152_v10  ;;  %296 = vmatpush.msrb.mxu0 %v1701_v12  ;;  %v1733_v25 = vld [vmem:[#allocation16] sm:$0xff] }
  0x29   :  { %355 = vmatpush.msrb.mxu1 %v1705_v15  ;;  %277 = vmatpush.msra.mxu3 %v1703_v13  ;;  %v1262_v26 = vld [vmem:[%s1924_s7] ss:$0 sm:$0xff] }
  0x2a   :  { %297 = vmatpush.msrb.mxu0 %v1714_v17  ;;  %1211 = vmatmul.msk.f32.vlgmr.msra.gmra.mxu3 %vm161_vm0, %v1712_v16  ;;  %v1263_v27 = vld [vmem:[%s1925_s8] ss:$0 sm:$0xff] }
  0x2b   :  { %236 = vmatpush.msra.mxu2 %v217_v18  ;;  %356 = vmatpush.msrb.mxu1 %v1721_v20  ;;  %v1264_v38 = vld [vmem:[%s1926_s9] ss:$0 sm:$0xff] }
  0x2c   :  { %298 = vmatpush.msrb.mxu0 %v1718_v19  ;;  %411 = vmatpush.msrb.mxu3 %v1701_v12  ;;  %v1790_v53 = vld [vmem:[%s1927_s10] sm:$0x1]  ;;  %s1582_s10 = smov [#allocation17]  }
  0x2d   :  { %237 = vmatpush.msra.mxu2 %v216_v21  ;;  %357 = vmatpush.msrb.mxu1 %v1729_v23  ;;  %s1177_s25 = sshll.u32 %s1582_s10, 4  ;;  %s1178_s25 = int_to_ptr.vmem [resolvable:$true] %s1177_s25 }
  0x2e   :  { %299 = vmatpush.msrb.mxu0 %v1727_v22  ;;  %412 = vmatpush.msrb.mxu3 %v1714_v17 }
  0x2f   :  { %1212 = vmatmul.msk.f32.vlgmr.msrb.gmra.mxu0 %vm161_vm0, %v1712_v16  ;;  %238 = vmatpush.msra.mxu2 %v215_v24 }
  0x30   :  { %1210 = vmatmul.msk.f32.vlgmr.msra.gmra.mxu2 %vm161_vm0, %v152_v10  ;;  %358 = vmatpush.msrb.mxu1 %v1733_v25 }
  0x31   :  { %1215 = vmatmul.msk.f32.vlgmr.msrb.gmra.mxu1 %vm161_vm0, %v1712_v16  ;;  %389 = vmatpush.msrb.mxu2 %v1693_v6 }
  0x32   :  { %470 = vmatpush.msra.mxu0 %v1705_v15  ;;  %503 = vmatpush.msra.mxu1 %v1693_v6 }
  0x33   :  { %390 = vmatpush.msrb.mxu2 %v1695_v7  ;;  %413 = vmatpush.msrb.mxu3 %v1718_v19 }
  0x34   :  { %471 = vmatpush.msra.mxu0 %v1721_v20  ;;  %504 = vmatpush.msra.mxu1 %v1695_v7 }
  0x35   :  { %391 = vmatpush.msrb.mxu2 %v1699_v11  ;;  %414 = vmatpush.msrb.mxu3 %v1727_v22 }
  0x36   :  { %472 = vmatpush.msra.mxu0 %v1729_v23  ;;  %505 = vmatpush.msra.mxu1 %v1699_v11 }
  0x37   :  { %392 = vmatpush.msrb.mxu2 %v1703_v13  ;;  %584 = vmatpush.msra.mxu3 %v1705_v15 }
  0x38   :  { %473 = vmatpush.msra.mxu0 %v1733_v25  ;;  %506 = vmatpush.msra.mxu1 %v1703_v13 }
  0x39   :  { %525 = vmatpush.msra.mxu2 %v1701_v12  ;;  %585 = vmatpush.msra.mxu3 %v1721_v20 }
  0x3a   :  { %617 = vmatpush.msrb.mxu0 %v1693_v6  ;;  %639 = vmatpush.msrb.mxu1 %v1701_v12 }
  0x3b   :  { %526 = vmatpush.msra.mxu2 %v1714_v17  ;;  %586 = vmatpush.msra.mxu3 %v1729_v23 }
  0x3c   :  { %618 = vmatpush.msrb.mxu0 %v1695_v7  ;;  %640 = vmatpush.msrb.mxu1 %v1714_v17 }
  0x3d   :  { %527 = vmatpush.msra.mxu2 %v1718_v19  ;;  %587 = vmatpush.msra.mxu3 %v1733_v25 }
  0x3e   :  { %619 = vmatpush.msrb.mxu0 %v1699_v11  ;;  %641 = vmatpush.msrb.mxu1 %v1718_v19 }
  0x3f   :  { %528 = vmatpush.msra.mxu2 %v1727_v22 }
  0x40   :  { %620 = vmatpush.msrb.mxu0 %v1703_v13  ;;  %642 = vmatpush.msrb.mxu1 %v1727_v22 }
  0xa4   :  { %v182_v28 = vpop.f32.mrf.mxu0 }
  0xa5   :  { %v211_v29 = vpop.f32.mrf.mxu1  ;;  %v183_v30 = vadd.f32 %v1262_v26, %v182_v28 }
  0xa6   :  { %v212_v31 = vadd.f32 %v1263_v27, %v211_v29 }
  0xa7   :  { %185 = vst.msk [vmem:[#allocation2] sm:$0xff] %vm161_vm0, %v183_v30 }
  0xa8   :  { %214 = vst.msk [vmem:[#allocation3] sm:$0xff] %vm161_vm0, %v212_v31 }
  0xac   :  { %v301_v32 = vpop.f32.mrf.mxu0 }
  0xad   :  { %v279_v34 = vpop.f32.mrf.mxu3 }
  0xae   :  { %v258_v33 = vld [vmem:[#allocation2] sm:$0x1]  ;;  %v360_v55 = vpop.f32.mrf.mxu1 }
  0xaf   :  { %v282_v35 = vadd.f32 %v279_v34, %v258_v33  ;;  %v283_v36 = vld [vmem:[#allocation3] sm:$0x1]  ;;  %v361_v60 = vadd.f32 %v360_v55, %v1790_v53  ;;  %v398_v28 = vld [vmem:[#allocation3 + $0x1] sm:$0x1] }
  0xb0   :  { %v304_v37 = vadd.f32 %v301_v32, %v283_v36 }
  0xb1   :  { %v1213_v39 = vmul.f32 -1.442695, %v282_v35 }
  0xb2   :  { %v1214_v40 = vmul.f32 -1.442695, %v304_v37 }
  0xb3   :  { %1265 = vpow2.f32 %v1213_v39  ;;  %v240_v41 = vpop.f32.mrf.mxu2 }
  0xb4   :  { %1267 = vpow2.f32 %v1214_v40  ;;  %v241_v42 = vadd.f32 %v1264_v38, %v240_v41 }
  0xb6   :  { %243 = vst.msk [vmem:[#allocation4] sm:$0xff] %vm161_vm0, %v241_v42 }
  0xb9   :  { %v1266_v43 = vpop.eup %1265 }
  0xba   :  { %v1268_v44 = vpop.eup %1267  ;;  %v308_v45 = vadd.f32 1.0, %v1266_v43 }
  0xbb   :  { %v327_v46 = vadd.f32 1.0, %v1268_v44 }
  0xbc   :  { %1269 = vrcp.f32 %v308_v45  ;;  %v320_v54 = vand.u32 2147483648, %v308_v45  ;;  %v318_v57 = vand.u32 2147483647, %v308_v45  ;;  %vm314_vm2 = vweird.f32 %v308_v45 }
  0xbd   :  { %1271 = vrcp.f32 %v327_v46  ;;  %vm333_vm5 = vweird.f32 %v327_v46  ;;  %v363_v1 = vld [vmem:[#allocation4] sm:$0x1]  ;;  %v339_v2 = vand.u32 2147483648, %v327_v46  ;;  %v337_v4 = vand.u32 2147483647, %v327_v46 }
  0xbe   :  { %v321_v61 = vor.u32 1.1754944e-38, %v320_v54  ;;  %vm319_vm4 = vcmp.eq.f32.partialorder %v318_v57, 8.507059e+37 }
  0xbf   :  { %v340_v9 = vor.u32 1.1754944e-38, %v339_v2  ;;  %vm338_vm8 = vcmp.eq.f32.partialorder %v337_v4, 8.507059e+37 }
  0xc2   :  { %v1270_v47 = vpop.eup %1269 }
  0xc3   :  { %v1272_v48 = vpop.eup %1271  ;;  %v310_v49 = vmul.f32 %v1270_v47, %v308_v45  ;;  %vm315_vm1 = vweird.f32 %v1270_v47 }
  0xc4   :  { %v329_v50 = vmul.f32 %v1272_v48, %v327_v46  ;;  %vm316_vm3 = vmor %vm314_vm2, %vm315_vm1  ;;  %vm334_vm6 = vweird.f32 %v1272_v48 }
  0xc5   :  { %v311_v51 = vsub.f32 1.0, %v310_v49  ;;  %vm335_vm7 = vmor %vm333_vm5, %vm334_vm6 }
  0xc6   :  { %v330_v52 = vsub.f32 1.0, %v329_v50 }
  0xc7   :  { %v312_v56 = vmul.f32 %v1270_v47, %v311_v51 }
  0xc8   :  { %v331_v58 = vmul.f32 %v1272_v48, %v330_v52 }
  0xc9   :  { %v313_v59 = vadd.f32 %v1270_v47, %v312_v56 }
  0xca   :  { %v332_v63 = vadd.f32 %v1272_v48, %v331_v58 }
  0xcb   :  { %v317_v62 = vsel %vm316_vm3, %v1270_v47, %v313_v59  ;;  %v478_v59 = vld [vmem:[#allocation4 + $0x1] sm:$0x1] }
  0xcc   :  { %v322_v0 = vsel %vm319_vm4, %v321_v61, %v317_v62  ;;  %v336_v8 = vsel %vm335_vm7, %v1272_v48, %v332_v63 }
  0xcd   :  { %v364_v3 = vmul.f32 %v361_v60, %v322_v0  ;;  %v341_v10 = vsel %vm338_vm8, %v340_v9, %v336_v8 }
  0xce   :  { %v367_v14 = vsub.f32 1.0, %v341_v10  ;;  %v369_v24 = vmul.f32 %v341_v10, %v1712_v16  ;;  %v373_v16 = vld [vmem:[#allocation2 + $0x1] sm:$0x1] }
  0xcf   :  { %v365_v5 = vadd.f32 %v364_v3, %v363_v1 }
  0xd1   :  { %1273 = vtanh.f32 %v365_v5  ;;  %v487_v5 = vld [vmem:[#allocation2 + $0x2] sm:$0x1] }
  0xd7   :  { %v1274_v18 = vpop.eup %1273 }
  0xd8   :  { %v368_v21 = vmul.f32 %v1274_v18, %v367_v14  ;;  %v512_v14 = vld [vmem:[#allocation3 + $0x2] sm:$0x1] }
  0xda   :  { %v1794_v26 = vadd.f32 %v369_v24, %v368_v21 }
  0xdc   :  { %372 = vst.msk [vmem:[#allocation17] sm:$0x1] %vm371_vm9, %v1794_v26  ;;  %1216 = vmatmul.msk.f32.vlgmr.msrb.gmra.mxu2 %vm161_vm0, %v1794_v26  ;;  %1217 = vmatmul.msk.f32.vlgmr.msrb.gmra.mxu3 %vm161_vm0, %v1794_v26 }
  0xdd   :  { %1220 = vmatmul.msk.f32.vlgmr.msra.gmra.mxu0 %vm161_vm0, %v1794_v26  ;;  %698 = vmatpush.msrb.mxu2 %v1705_v15 }
  0xde   :  { %731 = vmatpush.msrb.mxu3 %v1693_v6  ;;  %753 = vmatpush.msra.mxu0 %v1701_v12 }
  0xdf   :  { %699 = vmatpush.msrb.mxu2 %v1721_v20 }
  0xe0   :  { %732 = vmatpush.msrb.mxu3 %v1695_v7  ;;  %754 = vmatpush.msra.mxu0 %v1714_v17 }
  0xe1   :  { %700 = vmatpush.msrb.mxu2 %v1729_v23 }
  0xe2   :  { %733 = vmatpush.msrb.mxu3 %v1699_v11  ;;  %755 = vmatpush.msra.mxu0 %v1718_v19 }
  0xe3   :  { %701 = vmatpush.msrb.mxu2 %v1733_v25 }
  0xe4   :  { %734 = vmatpush.msrb.mxu3 %v1703_v13  ;;  %756 = vmatpush.msra.mxu0 %v1727_v22 }
 0x15a   :  { %v475_v47 = vpop.f32.mrf.mxu0 }
 0x15b   :  { %v476_v51 = vadd.f32 %v475_v47, %v1790_v53 }
 0x15f   :  { %v394_v27 = vpop.f32.mrf.mxu2  ;;  %v416_v29 = vpop.f32.mrf.mxu3 }
 0x160   :  { %v397_v30 = vadd.f32 %v394_v27, %v373_v16  ;;  %v419_v31 = vadd.f32 %v416_v29, %v398_v28 }
 0x162   :  { %v1218_v32 = vmul.f32 -1.442695, %v397_v30  ;;  %v1219_v33 = vmul.f32 -1.442695, %v419_v31 }
 0x164   :  { %1275 = vpow2.f32 %v1218_v32 }
 0x165   :  { %1277 = vpow2.f32 %v1219_v33 }
 0x16a   :  { %v1276_v34 = vpop.eup %1275 }
 0x16b   :  { %v1278_v35 = vpop.eup %1277  ;;  %v423_v36 = vadd.f32 1.0, %v1276_v34 }
 0x16c   :  { %v442_v37 = vadd.f32 1.0, %v1278_v35 }
 0x16d   :  { %1279 = vrcp.f32 %v423_v36  ;;  %v435_v43 = vand.u32 2147483648, %v423_v36  ;;  %v433_v46 = vand.u32 2147483647, %v423_v36  ;;  %vm429_vm11 = vweird.f32 %v423_v36 }
 0x16e   :  { %1281 = vrcp.f32 %v442_v37  ;;  %v454_v57 = vand.u32 2147483648, %v442_v37  ;;  %vm448_vm15 = vweird.f32 %v442_v37  ;;  %v452_v58 = vand.u32 2147483647, %v442_v37 }
 0x16f   :  { %v436_v50 = vor.u32 1.1754944e-38, %v435_v43  ;;  %vm434_vm13 = vcmp.eq.f32.partialorder %v433_v46, 8.507059e+37 }
 0x170   :  { %v455_v62 = vor.u32 1.1754944e-38, %v454_v57  ;;  %vm453_vm2 = vcmp.eq.f32.partialorder %v452_v58, 8.507059e+37 }
 0x173   :  { %v1280_v38 = vpop.eup %1279 }
 0x174   :  { %v1282_v39 = vpop.eup %1281  ;;  %v425_v40 = vmul.f32 %v1280_v38, %v423_v36  ;;  %vm430_vm10 = vweird.f32 %v1280_v38 }
 0x175   :  { %v444_v41 = vmul.f32 %v1282_v39, %v442_v37  ;;  %vm431_vm12 = vmor %vm429_vm11, %vm430_vm10  ;;  %vm449_vm14 = vweird.f32 %v1282_v39 }
 0x176   :  { %v426_v42 = vsub.f32 1.0, %v425_v40  ;;  %vm450_vm1 = vmor %vm448_vm15, %vm449_vm14 }
 0x177   :  { %v445_v44 = vsub.f32 1.0, %v444_v41 }
 0x178   :  { %v427_v45 = vmul.f32 %v1280_v38, %v426_v42 }
 0x179   :  { %v446_v48 = vmul.f32 %v1282_v39, %v445_v44 }
 0x17a   :  { %v428_v49 = vadd.f32 %v1280_v38, %v427_v45 }
 0x17b   :  { %v447_v55 = vadd.f32 %v1282_v39, %v446_v48  ;;  %v592_v48 = vld [vmem:[#allocation4 + $0x2] sm:$0x1] }
 0x17c   :  { %v432_v52 = vsel %vm431_vm12, %v1280_v38, %v428_v49 }
 0x17d   :  { %v437_v54 = vsel %vm434_vm13, %v436_v50, %v432_v52  ;;  %v451_v61 = vsel %vm450_vm1, %v1282_v39, %v447_v55 }
 0x17e   :  { %v479_v56 = vmul.f32 %v476_v51, %v437_v54  ;;  %v456_v63 = vsel %vm453_vm2, %v455_v62, %v451_v61  ;;  %v626_v62 = vld [vmem:[#allocation3 + $0x3] sm:$0x1] }
 0x17f   :  { %v482_v0 = vsub.f32 1.0, %v456_v63  ;;  %v484_v3 = vmul.f32 %v456_v63, %v1794_v26 }
 0x180   :  { %v480_v60 = vadd.f32 %v479_v56, %v478_v59 }
 0x182   :  { %1283 = vtanh.f32 %v480_v60  ;;  %v601_v60 = vld [vmem:[#allocation2 + $0x3] sm:$0x1] }
 0x188   :  { %v1284_v1 = vpop.eup %1283 }
 0x189   :  { %v483_v2 = vmul.f32 %v1284_v1, %v482_v0 }
 0x18b   :  { %v1818_v4 = vadd.f32 %v484_v3, %v483_v2 }
 0x18d   :  { %486 = vst.msk [vmem:[#allocation17 + $0x1] sm:$0x1] %vm371_vm9, %v1818_v4  ;;  %1221 = vmatmul.msk.f32.vlgmr.msra.gmra.mxu1 %vm161_vm0, %v1818_v4  ;;  %1222 = vmatmul.msk.f32.vlgmr.msra.gmra.mxu2 %vm161_vm0, %v1818_v4 }
 0x18e   :  { %1225 = vmatmul.msk.f32.vlgmr.msra.gmra.mxu3 %vm161_vm0, %v1818_v4  ;;  %812 = vmatpush.msra.mxu1 %v1705_v15 }
 0x18f   :  { %845 = vmatpush.msra.mxu2 %v1693_v6  ;;  %867 = vmatpush.msra.mxu3 %v1701_v12 }
 0x190   :  { %813 = vmatpush.msra.mxu1 %v1721_v20 }
 0x191   :  { %846 = vmatpush.msra.mxu2 %v1695_v7  ;;  %868 = vmatpush.msra.mxu3 %v1714_v17 }
 0x192   :  { %814 = vmatpush.msra.mxu1 %v1729_v23 }
 0x193   :  { %847 = vmatpush.msra.mxu2 %v1699_v11  ;;  %869 = vmatpush.msra.mxu3 %v1718_v19 }
 0x194   :  { %815 = vmatpush.msra.mxu1 %v1733_v25 }
 0x195   :  { %848 = vmatpush.msra.mxu2 %v1703_v13  ;;  %870 = vmatpush.msra.mxu3 %v1727_v22 }
 0x20a   :  { %v508_v8 = vpop.f32.mrf.mxu1 }
 0x20b   :  { %v511_v9 = vadd.f32 %v508_v8, %v487_v5 }
 0x20d   :  { %v1223_v10 = vmul.f32 -1.442695, %v511_v9 }
 0x20f   :  { %1285 = vpow2.f32 %v1223_v10 }
 0x210   :  { %v530_v18 = vpop.f32.mrf.mxu2 }
 0x211   :  { %v533_v21 = vadd.f32 %v530_v18, %v512_v14  ;;  %v589_v36 = vpop.f32.mrf.mxu3 }
 0x212   :  { %v590_v42 = vadd.f32 %v589_v36, %v1790_v53 }
 0x213   :  { %v1224_v24 = vmul.f32 -1.442695, %v533_v21 }
 0x215   :  { %v1286_v26 = vpop.eup %1285  ;;  %1287 = vpow2.f32 %v1224_v24 }
 0x216   :  { %v537_v16 = vadd.f32 1.0, %v1286_v26 }
 0x218   :  { %1289 = vrcp.f32 %v537_v16  ;;  %v549_v32 = vand.u32 2147483648, %v537_v16  ;;  %v547_v34 = vand.u32 2147483647, %v537_v16  ;;  %vm543_vm4 = vweird.f32 %v537_v16 }
 0x21a   :  { %v550_v39 = vor.u32 1.1754944e-38, %v549_v32  ;;  %vm548_vm6 = vcmp.eq.f32.partialorder %v547_v34, 8.507059e+37 }
 0x21b   :  { %v1288_v27 = vpop.eup %1287 }
 0x21c   :  { %v556_v28 = vadd.f32 1.0, %v1288_v27 }
 0x21e   :  { %v1290_v29 = vpop.eup %1289  ;;  %1291 = vrcp.f32 %v556_v28  ;;  %v568_v45 = vand.u32 2147483648, %v556_v28  ;;  %v566_v47 = vand.u32 2147483647, %v556_v28  ;;  %vm562_vm8 = vweird.f32 %v556_v28 }
 0x21f   :  { %v539_v30 = vmul.f32 %v1290_v29, %v537_v16  ;;  %vm544_vm3 = vweird.f32 %v1290_v29 }
 0x220   :  { %vm545_vm5 = vmor %vm543_vm4, %vm544_vm3  ;;  %v569_v51 = vor.u32 1.1754944e-38, %v568_v45  ;;  %vm567_vm11 = vcmp.eq.f32.partialorder %v566_v47, 8.507059e+37 }
 0x221   :  { %v540_v31 = vsub.f32 1.0, %v539_v30 }
 0x223   :  { %v541_v33 = vmul.f32 %v1290_v29, %v540_v31 }
 0x224   :  { %v1292_v35 = vpop.eup %1291 }
 0x225   :  { %v558_v37 = vmul.f32 %v1292_v35, %v556_v28  ;;  %v542_v38 = vadd.f32 %v1290_v29, %v541_v33  ;;  %vm563_vm7 = vweird.f32 %v1292_v35 }
 0x226   :  { %vm564_vm10 = vmor %vm562_vm8, %vm563_vm7 }
 0x227   :  { %v559_v40 = vsub.f32 1.0, %v558_v37  ;;  %v546_v41 = vsel %vm545_vm5, %v1290_v29, %v542_v38 }
 0x228   :  { %v551_v43 = vsel %vm548_vm6, %v550_v39, %v546_v41 }
 0x229   :  { %v560_v44 = vmul.f32 %v1292_v35, %v559_v40  ;;  %v593_v46 = vmul.f32 %v590_v42, %v551_v43  ;;  %v706_v40 = vld [vmem:[#allocation4 + $0x3] sm:$0x1] }
 0x22b   :  { %v561_v49 = vadd.f32 %v1292_v35, %v560_v44  ;;  %v594_v50 = vadd.f32 %v593_v46, %v592_v48 }
 0x22d   :  { %v565_v52 = vsel %vm564_vm10, %v1292_v35, %v561_v49  ;;  %1293 = vtanh.f32 %v594_v50 }
 0x22e   :  { %v570_v54 = vsel %vm567_vm11, %v569_v51, %v565_v52 }
 0x22f   :  { %v596_v55 = vsub.f32 1.0, %v570_v54  ;;  %v598_v58 = vmul.f32 %v570_v54, %v1818_v4 }
 0x233   :  { %v1294_v56 = vpop.eup %1293 }
 0x234   :  { %v597_v57 = vmul.f32 %v1294_v56, %v596_v55 }
 0x236   :  { %v1842_v59 = vadd.f32 %v598_v58, %v597_v57 }
 0x238   :  { %600 = vst.msk [vmem:[#allocation17 + $0x2] sm:$0x1] %vm371_vm9, %v1842_v59  ;;  %1226 = vmatmul.msk.f32.vlgmr.msrb.gmra.mxu0 %vm161_vm0, %v1842_v59  ;;  %1227 = vmatmul.msk.f32.vlgmr.msrb.gmra.mxu1 %vm161_vm0, %v1842_v59 }
 0x239   :  { %1230 = vmatmul.msk.f32.vlgmr.msrb.gmra.mxu2 %vm161_vm0, %v1842_v59  ;;  %926 = vmatpush.msrb.mxu0 %v1705_v15 }
 0x23a   :  { %959 = vmatpush.msrb.mxu1 %v1693_v6  ;;  %981 = vmatpush.msrb.mxu2 %v1701_v12 }
 0x23b   :  { %927 = vmatpush.msrb.mxu0 %v1721_v20 }
 0x23c   :  { %960 = vmatpush.msrb.mxu1 %v1695_v7  ;;  %982 = vmatpush.msrb.mxu2 %v1714_v17 }
 0x23d   :  { %928 = vmatpush.msrb.mxu0 %v1729_v23 }
 0x23e   :  { %961 = vmatpush.msrb.mxu1 %v1699_v11  ;;  %983 = vmatpush.msrb.mxu2 %v1718_v19 }
 0x23f   :  { %929 = vmatpush.msrb.mxu0 %v1733_v25 }
 0x240   :  { %962 = vmatpush.msrb.mxu1 %v1703_v13  ;;  %984 = vmatpush.msrb.mxu2 %v1727_v22 }
 0x2b5   :  { %v622_v61 = vpop.f32.mrf.mxu0  ;;  %v644_v63 = vpop.f32.mrf.mxu1 }
 0x2b6   :  { %v625_v0 = vadd.f32 %v622_v61, %v601_v60  ;;  %v647_v1 = vadd.f32 %v644_v63, %v626_v62 }
 0x2b8   :  { %v1228_v2 = vmul.f32 -1.442695, %v625_v0  ;;  %v1229_v3 = vmul.f32 -1.442695, %v647_v1 }
 0x2ba   :  { %1295 = vpow2.f32 %v1228_v2 }
 0x2bb   :  { %1297 = vpow2.f32 %v1229_v3 }
 0x2bc   :  { %v703_v30 = vpop.f32.mrf.mxu2 }
 0x2bd   :  { %v704_v34 = vadd.f32 %v703_v30, %v1790_v53 }
 0x2c0   :  { %v1296_v4 = vpop.eup %1295 }
 0x2c1   :  { %v1298_v5 = vpop.eup %1297  ;;  %v651_v8 = vadd.f32 1.0, %v1296_v4 }
 0x2c2   :  { %v670_v9 = vadd.f32 1.0, %v1298_v5 }
 0x2c3   :  { %1299 = vrcp.f32 %v651_v8  ;;  %v663_v16 = vand.u32 2147483648, %v651_v8  ;;  %v661_v28 = vand.u32 2147483647, %v651_v8  ;;  %vm657_vm13 = vweird.f32 %v651_v8 }
 0x2c4   :  { %1301 = vrcp.f32 %v670_v9  ;;  %v682_v37 = vand.u32 2147483648, %v670_v9  ;;  %vm676_vm2 = vweird.f32 %v670_v9  ;;  %v680_v39 = vand.u32 2147483647, %v670_v9 }
 0x2c5   :  { %v664_v32 = vor.u32 1.1754944e-38, %v663_v16  ;;  %vm662_vm15 = vcmp.eq.f32.partialorder %v661_v28, 8.507059e+37 }
 0x2c6   :  { %v683_v43 = vor.u32 1.1754944e-38, %v682_v37  ;;  %vm681_vm4 = vcmp.eq.f32.partialorder %v680_v39, 8.507059e+37 }
 0x2c9   :  { %v1300_v10 = vpop.eup %1299 }
 0x2ca   :  { %v1302_v14 = vpop.eup %1301  ;;  %v653_v18 = vmul.f32 %v1300_v10, %v651_v8  ;;  %vm658_vm12 = vweird.f32 %v1300_v10 }
 0x2cb   :  { %v672_v21 = vmul.f32 %v1302_v14, %v670_v9  ;;  %vm659_vm14 = vmor %vm657_vm13, %vm658_vm12  ;;  %vm677_vm1 = vweird.f32 %v1302_v14 }
 0x2cc   :  { %v654_v24 = vsub.f32 1.0, %v653_v18  ;;  %vm678_vm3 = vmor %vm676_vm2, %vm677_vm1 }
 0x2cd   :  { %v673_v26 = vsub.f32 1.0, %v672_v21  ;;  %v820_v21 = vld [vmem:[#allocation4 + $0x4] sm:$0x1] }
 0x2ce   :  { %v655_v27 = vmul.f32 %v1300_v10, %v654_v24 }
 0x2cf   :  { %v674_v29 = vmul.f32 %v1302_v14, %v673_v26 }
 0x2d0   :  { %v656_v31 = vadd.f32 %v1300_v10, %v655_v27 }
 0x2d1   :  { %v675_v35 = vadd.f32 %v1302_v14, %v674_v29 }
 0x2d2   :  { %v660_v33 = vsel %vm659_vm14, %v1300_v10, %v656_v31 }
 0x2d3   :  { %v665_v36 = vsel %vm662_vm15, %v664_v32, %v660_v33  ;;  %v679_v42 = vsel %vm678_vm3, %v1302_v14, %v675_v35  ;;  %v829_v33 = vld [vmem:[#allocation2 + $0x5] sm:$0x1]  ;;  %v854_v35 = vld [vmem:[#allocation3 + $0x5] sm:$0x1] }
 0x2d4   :  { %v707_v38 = vmul.f32 %v704_v34, %v665_v36  ;;  %v684_v44 = vsel %vm681_vm4, %v683_v43, %v679_v42 }
 0x2d5   :  { %v710_v45 = vsub.f32 1.0, %v684_v44  ;;  %v712_v48 = vmul.f32 %v684_v44, %v1842_v59 }
 0x2d6   :  { %v708_v41 = vadd.f32 %v707_v38, %v706_v40 }
 0x2d8   :  { %1303 = vtanh.f32 %v708_v41 }
 0x2de   :  { %v1304_v46 = vpop.eup %1303 }
 0x2df   :  { %v711_v47 = vmul.f32 %v1304_v46, %v710_v45 }
 0x2e1   :  { %v1866_v49 = vadd.f32 %v712_v48, %v711_v47 }
 0x2e3   :  { %714 = vst.msk [vmem:[#allocation17 + $0x3] sm:$0x1] %vm371_vm9, %v1866_v49  ;;  %1231 = vmatmul.msk.f32.vlgmr.msrb.gmra.mxu3 %vm161_vm0, %v1866_v49  ;;  %1232 = vmatmul.msk.f32.vlgmr.msra.gmra.mxu0 %vm161_vm0, %v1866_v49 }
 0x2e4   :  { %1235 = vmatmul.msk.f32.vlgmr.msra.gmra.mxu1 %vm161_vm0, %v1866_v49  ;;  %1040 = vmatpush.msrb.mxu3 %v1705_v15 }
 0x2e5   :  { %1073 = vmatpush.msra.mxu0 %v1693_v6  ;;  %1095 = vmatpush.msra.mxu1 %v1701_v12  ;;  %v740_v6 = vld [vmem:[#allocation3 + $0x4] sm:$0x1] }
 0x2e6   :  { %1041 = vmatpush.msrb.mxu3 %v1721_v20 }
 0x2e7   :  { %1074 = vmatpush.msra.mxu0 %v1695_v7  ;;  %1096 = vmatpush.msra.mxu1 %v1714_v17  ;;  %v715_v7 = vld [vmem:[#allocation2 + $0x4] sm:$0x1] }
 0x2e8   :  { %1042 = vmatpush.msrb.mxu3 %v1729_v23 }
 0x2e9   :  { %1075 = vmatpush.msra.mxu0 %v1699_v11  ;;  %1097 = vmatpush.msra.mxu1 %v1718_v19 }
 0x2ea   :  { %1043 = vmatpush.msrb.mxu3 %v1733_v25 }
 0x2eb   :  { %1076 = vmatpush.msra.mxu0 %v1703_v13  ;;  %1098 = vmatpush.msra.mxu1 %v1727_v22 }
 0x360   :  { %v758_v12 = vpop.f32.mrf.mxu0 }
 0x361   :  { %v761_v50 = vadd.f32 %v758_v12, %v740_v6  ;;  %v817_v1 = vpop.f32.mrf.mxu1 }
 0x362   :  { %v818_v4 = vadd.f32 %v817_v1, %v1790_v53 }
 0x363   :  { %v1234_v51 = vmul.f32 -1.442695, %v761_v50 }
 0x365   :  { %1305 = vpow2.f32 %v1234_v51 }
 0x366   :  { %v736_v52 = vpop.f32.mrf.mxu3 }
 0x367   :  { %v739_v17 = vadd.f32 %v736_v52, %v715_v7 }
 0x369   :  { %v1233_v54 = vmul.f32 -1.442695, %v739_v17 }
 0x36b   :  { %v1306_v55 = vpop.eup %1305  ;;  %1307 = vpow2.f32 %v1233_v54 }
 0x36c   :  { %v784_v11 = vadd.f32 1.0, %v1306_v55 }
 0x36e   :  { %1309 = vrcp.f32 %v784_v11  ;;  %v796_v10 = vand.u32 2147483648, %v784_v11  ;;  %vm790_vm11 = vweird.f32 %v784_v11  ;;  %v794_v18 = vand.u32 2147483647, %v784_v11 }
 0x370   :  { %v797_v16 = vor.u32 1.1754944e-38, %v796_v10  ;;  %vm795_vm13 = vcmp.eq.f32.partialorder %v794_v18, 8.507059e+37 }
 0x371   :  { %v1308_v19 = vpop.eup %1307 }
 0x372   :  { %v765_v56 = vadd.f32 1.0, %v1308_v19 }
 0x374   :  { %1311 = vrcp.f32 %v765_v56  ;;  %v1310_v57 = vpop.eup %1309  ;;  %v777_v61 = vand.u32 2147483648, %v765_v56  ;;  %v775_v63 = vand.u32 2147483647, %v765_v56  ;;  %vm771_vm6 = vweird.f32 %v765_v56 }
 0x375   :  { %v786_v13 = vmul.f32 %v1310_v57, %v784_v11  ;;  %vm791_vm10 = vweird.f32 %v1310_v57 }
 0x376   :  { %v778_v3 = vor.u32 1.1754944e-38, %v777_v61  ;;  %vm776_vm8 = vcmp.eq.f32.partialorder %v775_v63, 8.507059e+37  ;;  %vm792_vm12 = vmor %vm790_vm11, %vm791_vm10 }
 0x377   :  { %v787_v59 = vsub.f32 1.0, %v786_v13 }
 0x379   :  { %v788_v0 = vmul.f32 %v1310_v57, %v787_v59 }
 0x37a   :  { %v1312_v58 = vpop.eup %1311 }
 0x37b   :  { %v767_v22 = vmul.f32 %v1312_v58, %v765_v56  ;;  %vm772_vm5 = vweird.f32 %v1312_v58  ;;  %v789_v8 = vadd.f32 %v1310_v57, %v788_v0  ;;  %v934_v56 = vld [vmem:[#allocation4 + $0x5] sm:$0x1]  ;;  %v943_v0 = vld [vmem:[#allocation2 + $0x6] sm:$0x1] }
 0x37c   :  { %vm773_vm7 = vmor %vm771_vm6, %vm772_vm5 }
 0x37d   :  { %v768_v60 = vsub.f32 1.0, %v767_v22  ;;  %v793_v26 = vsel %vm792_vm12, %v1310_v57, %v789_v8 }
 0x37e   :  { %v798_v27 = vsel %vm795_vm13, %v797_v16, %v793_v26 }
 0x37f   :  { %v769_v62 = vmul.f32 %v1312_v58, %v768_v60  ;;  %v824_v28 = vsub.f32 1.0, %v798_v27  ;;  %v826_v31 = vmul.f32 %v798_v27, %v1866_v49 }
 0x381   :  { %v770_v2 = vadd.f32 %v1312_v58, %v769_v62 }
 0x383   :  { %v774_v5 = vsel %vm773_vm7, %v1312_v58, %v770_v2 }
 0x384   :  { %v779_v9 = vsel %vm776_vm8, %v778_v3, %v774_v5 }
 0x385   :  { %v821_v14 = vmul.f32 %v818_v4, %v779_v9  ;;  %v968_v4 = vld [vmem:[#allocation3 + $0x6] sm:$0x1] }
 0x387   :  { %v822_v24 = vadd.f32 %v821_v14, %v820_v21 }
 0x389   :  { %1313 = vtanh.f32 %v822_v24 }
 0x38f   :  { %v1314_v29 = vpop.eup %1313 }
 0x390   :  { %v825_v30 = vmul.f32 %v1314_v29, %v824_v28 }
 0x392   :  { %v827_v32 = vadd.f32 %v826_v31, %v825_v30 }
 0x394   :  { %828 = vst.msk [vmem:[#allocation17 + $0x4] sm:$0x1] %vm371_vm9, %v827_v32  ;;  %1236 = vmatmul.msk.f32.vlgmr.msra.gmra.mxu2 %vm161_vm0, %v827_v32  ;;  %1237 = vmatmul.msk.f32.vlgmr.msra.gmra.mxu3 %vm161_vm0, %v827_v32 }
 0x395   :  { %1240 = vmatmul.msk.f32.vlgmr.msrb.gmra.mxu0 %vm161_vm0, %v827_v32  ;;  %1154 = vmatpush.msra.mxu2 %v1705_v15 }
 0x397   :  { %1155 = vmatpush.msra.mxu2 %v1721_v20 }
 0x399   :  { %1156 = vmatpush.msra.mxu2 %v1729_v23 }
 0x39b   :  { %1157 = vmatpush.msra.mxu2 %v1733_v25 }
 0x412   :  { %v931_v6 = vpop.f32.mrf.mxu0 }
 0x413   :  { %v932_v7 = vadd.f32 %v931_v6, %v1790_v53  ;;  %v1057_v6 = vld [vmem:[#allocation2 + $0x7] sm:$0x1] }
 0x417   :  { %v850_v34 = vpop.f32.mrf.mxu2  ;;  %v872_v36 = vpop.f32.mrf.mxu3 }
 0x418   :  { %v853_v37 = vadd.f32 %v850_v34, %v829_v33  ;;  %v875_v38 = vadd.f32 %v872_v36, %v854_v35 }
 0x41a   :  { %v1238_v39 = vmul.f32 -1.442695, %v853_v37  ;;  %v1239_v40 = vmul.f32 -1.442695, %v875_v38 }
 0x41c   :  { %1315 = vpow2.f32 %v1238_v39 }
 0x41d   :  { %1317 = vpow2.f32 %v1239_v40 }
 0x422   :  { %v1316_v41 = vpop.eup %1315 }
 0x423   :  { %v1318_v42 = vpop.eup %1317  ;;  %v879_v43 = vadd.f32 1.0, %v1316_v41 }
 0x424   :  { %v898_v15 = vadd.f32 1.0, %v1318_v42 }
 0x425   :  { %1319 = vrcp.f32 %v879_v43  ;;  %v891_v46 = vand.u32 2147483648, %v879_v43  ;;  %v889_v49 = vand.u32 2147483647, %v879_v43  ;;  %vm885_vm15 = vweird.f32 %v879_v43 }
 0x426   :  { %1321 = vrcp.f32 %v898_v15  ;;  %v910_v11 = vand.u32 2147483648, %v898_v15  ;;  %vm904_vm4 = vweird.f32 %v898_v15  ;;  %v908_v19 = vand.u32 2147483647, %v898_v15 }
 0x427   :  { %v892_v51 = vor.u32 1.1754944e-38, %v891_v46  ;;  %vm890_vm2 = vcmp.eq.f32.partialorder %v889_v49, 8.507059e+37 }
 0x428   :  { %v911_v58 = vor.u32 1.1754944e-38, %v910_v11  ;;  %vm909_vm6 = vcmp.eq.f32.partialorder %v908_v19, 8.507059e+37 }
 0x42b   :  { %v1320_v20 = vpop.eup %1319 }
 0x42c   :  { %v1322_v23 = vpop.eup %1321  ;;  %v881_v44 = vmul.f32 %v1320_v20, %v879_v43  ;;  %vm886_vm14 = vweird.f32 %v1320_v20  ;;  %v1048_v43 = vld [vmem:[#allocation4 + $0x6] sm:$0x1] }
 0x42d   :  { %v900_v25 = vmul.f32 %v1322_v23, %v898_v15  ;;  %vm887_vm1 = vmor %vm885_vm15, %vm886_vm14  ;;  %vm905_vm3 = vweird.f32 %v1322_v23 }
 0x42e   :  { %v882_v45 = vsub.f32 1.0, %v881_v44  ;;  %vm906_vm5 = vmor %vm904_vm4, %vm905_vm3 }
 0x42f   :  { %v901_v47 = vsub.f32 1.0, %v900_v25 }
 0x430   :  { %v883_v48 = vmul.f32 %v1320_v20, %v882_v45 }
 0x431   :  { %v902_v12 = vmul.f32 %v1322_v23, %v901_v47 }
 0x432   :  { %v884_v50 = vadd.f32 %v1320_v20, %v883_v48 }
 0x433   :  { %v903_v54 = vadd.f32 %v1322_v23, %v902_v12 }
 0x434   :  { %v888_v52 = vsel %vm887_vm1, %v1320_v20, %v884_v50  ;;  %v1082_v50 = vld [vmem:[#allocation3 + $0x7] sm:$0x1] }
 0x435   :  { %v893_v17 = vsel %vm890_vm2, %v892_v51, %v888_v52  ;;  %v907_v13 = vsel %vm906_vm5, %v1322_v23, %v903_v54 }
 0x436   :  { %v935_v55 = vmul.f32 %v932_v7, %v893_v17  ;;  %v912_v22 = vsel %vm909_vm6, %v911_v58, %v907_v13 }
 0x437   :  { %v938_v59 = vsub.f32 1.0, %v912_v22  ;;  %v940_v62 = vmul.f32 %v912_v22, %v827_v32 }
 0x438   :  { %v936_v57 = vadd.f32 %v935_v55, %v934_v56 }
 0x43a   :  { %1323 = vtanh.f32 %v936_v57 }
 0x440   :  { %v1324_v60 = vpop.eup %1323 }
 0x441   :  { %v939_v61 = vmul.f32 %v1324_v60, %v938_v59 }
 0x443   :  { %v941_v63 = vadd.f32 %v940_v62, %v939_v61 }
 0x445   :  { %942 = vst.msk [vmem:[#allocation17 + $0x5] sm:$0x1] %vm371_vm9, %v941_v63  ;;  %1241 = vmatmul.msk.f32.vlgmr.msrb.gmra.mxu1 %vm161_vm0, %v941_v63  ;;  %1242 = vmatmul.msk.f32.vlgmr.msrb.gmra.mxu2 %vm161_vm0, %v941_v63 }
 0x446   :  { %1245 = vmatmul.msk.f32.vlgmr.msrb.gmra.mxu3 %vm161_vm0, %v941_v63 }
 0x4c2   :  { %v964_v1 = vpop.f32.mrf.mxu1 }
 0x4c3   :  { %v967_v2 = vadd.f32 %v964_v1, %v943_v0 }
 0x4c5   :  { %v1243_v3 = vmul.f32 -1.442695, %v967_v2 }
 0x4c7   :  { %1325 = vpow2.f32 %v1243_v3 }
 0x4c8   :  { %v986_v5 = vpop.f32.mrf.mxu2 }
 0x4c9   :  { %v989_v8 = vadd.f32 %v986_v5, %v968_v4  ;;  %v1045_v31 = vpop.f32.mrf.mxu3 }
 0x4ca   :  { %v1046_v37 = vadd.f32 %v1045_v31, %v1790_v53 }
 0x4cb   :  { %v1244_v9 = vmul.f32 -1.442695, %v989_v8 }
 0x4cd   :  { %v1326_v10 = vpop.eup %1325  ;;  %1327 = vpow2.f32 %v1244_v9 }
 0x4ce   :  { %v993_v14 = vadd.f32 1.0, %v1326_v10 }
 0x4d0   :  { %1329 = vrcp.f32 %v993_v14  ;;  %v1005_v27 = vand.u32 2147483648, %v993_v14  ;;  %v1003_v29 = vand.u32 2147483647, %v993_v14  ;;  %vm999_vm8 = vweird.f32 %v993_v14 }
 0x4d2   :  { %v1006_v34 = vor.u32 1.1754944e-38, %v1005_v27  ;;  %vm1004_vm11 = vcmp.eq.f32.partialorder %v1003_v29, 8.507059e+37 }
 0x4d3   :  { %v1328_v18 = vpop.eup %1327 }
 0x4d4   :  { %v1012_v21 = vadd.f32 1.0, %v1328_v18 }
 0x4d6   :  { %v1330_v24 = vpop.eup %1329  ;;  %1331 = vrcp.f32 %v1012_v21  ;;  %v1024_v40 = vand.u32 2147483648, %v1012_v21  ;;  %v1022_v42 = vand.u32 2147483647, %v1012_v21  ;;  %vm1018_vm13 = vweird.f32 %v1012_v21 }
 0x4d7   :  { %v995_v26 = vmul.f32 %v1330_v24, %v993_v14  ;;  %vm1000_vm7 = vweird.f32 %v1330_v24 }
 0x4d8   :  { %vm1001_vm10 = vmor %vm999_vm8, %vm1000_vm7  ;;  %v1025_v23 = vor.u32 1.1754944e-38, %v1024_v40  ;;  %vm1023_vm15 = vcmp.eq.f32.partialorder %v1022_v42, 8.507059e+37 }
 0x4d9   :  { %v996_v16 = vsub.f32 1.0, %v995_v26 }
 0x4db   :  { %v997_v28 = vmul.f32 %v1330_v24, %v996_v16 }
 0x4dc   :  { %v1332_v30 = vpop.eup %1331 }
 0x4dd   :  { %v1014_v32 = vmul.f32 %v1332_v30, %v1012_v21  ;;  %v998_v33 = vadd.f32 %v1330_v24, %v997_v28  ;;  %vm1019_vm12 = vweird.f32 %v1332_v30  ;;  %v1162_v21 = vld [vmem:[#allocation4 + $0x7] sm:$0x1] }
 0x4de   :  { %vm1020_vm14 = vmor %vm1018_vm13, %vm1019_vm12 }
 0x4df   :  { %v1015_v35 = vsub.f32 1.0, %v1014_v32  ;;  %v1002_v36 = vsel %vm1001_vm10, %v1330_v24, %v998_v33 }
 0x4e0   :  { %v1007_v38 = vsel %vm1004_vm11, %v1006_v34, %v1002_v36 }
 0x4e1   :  { %v1016_v39 = vmul.f32 %v1332_v30, %v1015_v35  ;;  %v1049_v41 = vmul.f32 %v1046_v37, %v1007_v38 }
 0x4e3   :  { %v1017_v15 = vadd.f32 %v1332_v30, %v1016_v39  ;;  %v1050_v20 = vadd.f32 %v1049_v41, %v1048_v43 }
 0x4e5   :  { %v1021_v44 = vsel %vm1020_vm14, %v1332_v30, %v1017_v15  ;;  %1333 = vtanh.f32 %v1050_v20 }
 0x4e6   :  { %v1026_v25 = vsel %vm1023_vm15, %v1025_v23, %v1021_v44 }
 0x4e7   :  { %v1052_v45 = vsub.f32 1.0, %v1026_v25  ;;  %v1054_v48 = vmul.f32 %v1026_v25, %v941_v63 }
 0x4eb   :  { %v1334_v46 = vpop.eup %1333 }
 0x4ec   :  { %v1053_v47 = vmul.f32 %v1334_v46, %v1052_v45 }
 0x4ee   :  { %v1055_v49 = vadd.f32 %v1054_v48, %v1053_v47 }
 0x4f0   :  { %1056 = vst.msk [vmem:[#allocation17 + $0x6] sm:$0x1] %vm371_vm9, %v1055_v49  ;;  %1246 = vmatmul.msk.f32.vlgmr.msra.gmra.mxu0 %vm161_vm0, %v1055_v49  ;;  %1247 = vmatmul.msk.f32.vlgmr.msra.gmra.mxu1 %vm161_vm0, %v1055_v49 }
 0x4f1   :  { %1250 = vmatmul.msk.f32.vlgmr.msra.gmra.mxu2 %vm161_vm0, %v1055_v49 }
 0x56d   :  { %v1078_v12 = vpop.f32.mrf.mxu0  ;;  %v1100_v51 = vpop.f32.mrf.mxu1 }
 0x56e   :  { %v1081_v7 = vadd.f32 %v1078_v12, %v1057_v6  ;;  %v1103_v52 = vadd.f32 %v1100_v51, %v1082_v50 }
 0x570   :  { %v1248_v17 = vmul.f32 -1.442695, %v1081_v7  ;;  %v1249_v54 = vmul.f32 -1.442695, %v1103_v52 }
 0x572   :  { %1335 = vpow2.f32 %v1248_v17 }
 0x573   :  { %1337 = vpow2.f32 %v1249_v54 }
 0x574   :  { %v1159_v1 = vpop.f32.mrf.mxu2 }
 0x575   :  { %v1160_v5 = vadd.f32 %v1159_v1, %v1790_v53 }
 0x578   :  { %v1336_v55 = vpop.eup %1335 }
 0x579   :  { %v1338_v11 = vpop.eup %1337  ;;  %v1107_v19 = vadd.f32 1.0, %v1336_v55 }
 0x57a   :  { %v1126_v56 = vadd.f32 1.0, %v1338_v11 }
 0x57b   :  { %1339 = vrcp.f32 %v1107_v19  ;;  %v1119_v61 = vand.u32 2147483648, %v1107_v19  ;;  %v1117_v63 = vand.u32 2147483647, %v1107_v19  ;;  %vm1113_vm1 = vweird.f32 %v1107_v19 }
 0x57c   :  { %1341 = vrcp.f32 %v1126_v56  ;;  %v1138_v10 = vand.u32 2147483648, %v1126_v56  ;;  %vm1132_vm5 = vweird.f32 %v1126_v56  ;;  %v1136_v18 = vand.u32 2147483647, %v1126_v56 }
 0x57d   :  { %v1120_v3 = vor.u32 1.1754944e-38, %v1119_v61  ;;  %vm1118_vm3 = vcmp.eq.f32.partialorder %v1117_v63, 8.507059e+37 }
 0x57e   :  { %v1139_v16 = vor.u32 1.1754944e-38, %v1138_v10  ;;  %vm1137_vm7 = vcmp.eq.f32.partialorder %v1136_v18, 8.507059e+37 }
 0x581   :  { %v1340_v57 = vpop.eup %1339 }
 0x582   :  { %v1342_v13 = vpop.eup %1341  ;;  %v1109_v58 = vmul.f32 %v1340_v57, %v1107_v19  ;;  %vm1114_vm0 = vweird.f32 %v1340_v57 }
 0x583   :  { %v1128_v22 = vmul.f32 %v1342_v13, %v1126_v56  ;;  %vm1115_vm2 = vmor %vm1113_vm1, %vm1114_vm0  ;;  %vm1133_vm4 = vweird.f32 %v1342_v13 }
 0x584   :  { %v1110_v59 = vsub.f32 1.0, %v1109_v58  ;;  %vm1134_vm6 = vmor %vm1132_vm5, %vm1133_vm4 }
 0x585   :  { %v1129_v60 = vsub.f32 1.0, %v1128_v22 }
 0x586   :  { %v1111_v62 = vmul.f32 %v1340_v57, %v1110_v59 }
 0x587   :  { %v1130_v0 = vmul.f32 %v1342_v13, %v1129_v60 }
 0x588   :  { %v1112_v2 = vadd.f32 %v1340_v57, %v1111_v62 }
 0x589   :  { %v1131_v8 = vadd.f32 %v1342_v13, %v1130_v0 }
 0x58a   :  { %v1116_v4 = vsel %vm1115_vm2, %v1340_v57, %v1112_v2 }
 0x58b   :  { %v1121_v9 = vsel %vm1118_vm3, %v1120_v3, %v1116_v4  ;;  %v1135_v26 = vsel %vm1134_vm6, %v1342_v13, %v1131_v8 }
 0x58c   :  { %v1163_v14 = vmul.f32 %v1160_v5, %v1121_v9  ;;  %v1140_v27 = vsel %vm1137_vm7, %v1139_v16, %v1135_v26 }
 0x58d   :  { %v1166_v28 = vsub.f32 1.0, %v1140_v27  ;;  %v1168_v30 = vmul.f32 %v1140_v27, %v1055_v49 }
 0x58e   :  { %v1164_v24 = vadd.f32 %v1163_v14, %v1162_v21 }
 0x590   :  { %1343 = vtanh.f32 %v1164_v24 }
 0x596   :  { %v1344_v29 = vpop.eup %1343 }
 0x597   :  { %v1167_v53 = vmul.f32 %v1344_v29, %v1166_v28 }
 0x599   :  { %v1169_v31 = vadd.f32 %v1168_v30, %v1167_v53 }
 0x59b   :  { %1170 = vst.msk [vmem:[#allocation17 + $0x7] sm:$0x1] %vm371_vm9, %v1169_v31 }
 0x59c   :  { %1171 = vst.msk [vmem:[#allocation18] sm:$0x1] %vm371_vm9, %v1169_v31  ;;  %1182 = dma.vmem_to_hbm [thread:$0]  %s1178_s25, 128, %s1180_s27, [#allocation7]  }
 0x59d   :  { %1193 = dma.vmem_to_hbm [thread:$0]  %s1189_s29, 16, %s1191_s0, [#allocation19]  }
 0x59e   :  { %1569 = dma.done.wait [#allocation7], 128  }
 0x59f   :  { %1570 = vsyncadd [#allocation7], 4294967168 }
 0x5a0   :  { %1571 = dma.done.wait [#allocation19], 16  }
 0x5a1   :  { %1572 = vsyncadd [#allocation19], 4294967280 }
 0x5a2   :  { %1202 = vsyncpa [#allocation6], 1 }
 0x5a3   :  { %1203 = vsyncpa [#allocation9], 1 }
 0x5a4   :  { %1204 = vsyncpa [#allocation12], 1 }
 0x5a5   :  { %1205 = vsyncpa [#allocation15], 1 }
 0x5a6   :  { %1206 = vsyncpa [#allocation7], 1 }
 0x5a7   :  { %1207 = vsyncpa [#allocation19], 1 }

</bundles_post_ra>
